<compile_context>
chip_gen: v7x
topology: tpu7x:2x2x1
jax: 0.10.0
libtpu: 0.0.40
codegen_flags: <defaults>
</compile_context>

<pallas_src>
import functools
import math

import jax
import jax.numpy as jnp
from jax import lax
from jax.experimental import pallas as pl
from jax.experimental.pallas import tpu as pltpu


MASK_VALUE = -1e30


# ---------------------------------------------------------------------------
# helpers
# ---------------------------------------------------------------------------
def _round_up(x: int, m: int) -> int:
    return ((x + m - 1) // m) * m


def _pick_tile(dim: int, target: int, quantum: int = 128) -> int:
    """Largest multiple-of-`quantum` divisor of `dim` that is <= target.
    `dim` must be a multiple of `quantum`."""
    t = max(quantum, (min(target, dim) // quantum) * quantum)
    while dim % t:
        t -= quantum
    return t


def _vmem_limit(block_bytes: int, scratch_bytes: int = 0) -> int:
    # Blocks are double-buffered by the pipeline.  Never go below the 32 MiB
    # scoped default (so small configs behave exactly like the default), cap
    # well under physical VMEM.
    need = 2 * block_bytes + scratch_bytes + (4 << 20)
    return max(32 << 20, min(need, 100 << 20))


# ---------------------------------------------------------------------------
# Linear: y = x @ W + b, row- (and optionally col-) tiled.  W / b use
# i-independent index maps so each slab is fetched once and stays resident.
# The activation cast to the matmul dtype happens in-kernel (free VPU op).
# ---------------------------------------------------------------------------
def _linear_kernel(x_ref, w_ref, b_ref, o_ref):
    x = x_ref[...].astype(w_ref.dtype)          # fused activation cast
    acc = jnp.dot(x, w_ref[...], preferred_element_type=jnp.float32)
    o_ref[...] = (acc + b_ref[...]).astype(o_ref.dtype)


def _linear(x, w, b, *, out_dtype, row_tile=512, col_tile=4096):
    """x: (M, K) any float dtype, W: (K, N) compute dtype, b: (1, N) f32.
    M must be a multiple of 128 (the wrapper pads)."""
    M, K = x.shape
    _, N = w.shape
    assert M % 128 == 0
    # prefer >=2 row tiles so the 1-D parallel axis shards across 2 TCs (v7x)
    tm = _pick_tile(M, min(row_tile, max(128, M // 2)))
    tn = N if N <= col_tile else (_pick_tile(N, col_tile) if N % 128 == 0 else N)
    block_bytes = (tm * K * x.dtype.itemsize + K * tn * w.dtype.itemsize
                   + tn * 4 + tm * tn * jnp.dtype(out_dtype).itemsize)
    return pl.pallas_call(
        _linear_kernel,
        out_shape=jax.ShapeDtypeStruct((M, N), out_dtype),
        grid=(M // tm, N // tn),
        in_specs=[
            pl.BlockSpec((tm, K), lambda i, j: (i, 0)),
            # i-independent index -> slab fetched once per j and kept resident.
            # For very large C (production ControlNet widths), additionally set
            # pipeline_mode=pl.Buffered(1) here to drop the unused 2nd buffer.
            pl.BlockSpec((K, tn), lambda i, j: (0, j)),
            pl.BlockSpec((1, tn), lambda i, j: (0, j)),   # bias kept f32
        ],
        out_specs=pl.BlockSpec((tm, tn), lambda i, j: (i, j)),
        compiler_params=pltpu.CompilerParams(
            dimension_semantics=("parallel", "parallel"),
            vmem_limit_bytes=_vmem_limit(block_bytes)),
    )(x, w, b)


# ---------------------------------------------------------------------------
# Flash attention on the fused qkv layout.
# grid = (B, heads//gh, S//tq, S//tk); kv axis innermost / arbitrary.
# Each step sees (tq, gh*hd) q and (tk, gh*hd) k/v slabs (gh heads side by
# side, lane-dense when gh*hd == 128) and unrolls the gh heads as separate
# 64-wide-contraction dots with per-head online-softmax state.
# ---------------------------------------------------------------------------
def _flash_kernel(q_ref, k_ref, v_ref, o_ref, m_sc, l_sc, acc_sc, *,
                  gh, hd, kv_tile, kv_valid, needs_mask, exp_dtype):
    ki = pl.program_id(3)

    @pl.when(ki == 0)
    def _():
        m_sc[...] = jnp.full_like(m_sc, -jnp.inf)
        l_sc[...] = jnp.zeros_like(l_sc)
        acc_sc[...] = jnp.zeros_like(acc_sc)

    q = q_ref[...]                      # (tq, gh*hd) bf16; 1/sqrt(hd) folded into w_in
    k = k_ref[...]                      # (tk, gh*hd)
    v = v_ref[...]                      # (tk, gh*hd)

    if needs_mask:                      # static: only emitted when S was padded
        col = ki * kv_tile + lax.broadcasted_iota(
            jnp.int32, (q.shape[0], kv_tile), 1)
        key_mask = col < kv_valid       # (tq, tk)

    for g in range(gh):                 # static unroll over heads in the group
        sl = slice(g * hd, (g + 1) * hd)
        # QK^T: contract the minor dims directly (no k.T / XLU transpose).
        s = lax.dot_general(q[:, sl], k[:, sl], (((1,), (1,)), ((), ())),
                            preferred_element_type=jnp.float32)   # (tq, tk) f32
        if needs_mask:
            s = jnp.where(key_mask, s, MASK_VALUE)

        m_prev = m_sc[g]                                           # (tq, 1) f32
        m_new = jnp.maximum(m_prev, jnp.max(s, axis=-1, keepdims=True))
        alpha = jnp.exp(m_prev - m_new)                            # f32
        # exp in bf16 (EUP relief on v6e/v7x); use exp_dtype=f32 on v5e.
        p = jnp.exp((s - m_new).astype(exp_dtype))
        l_sc[g] = alpha * l_sc[g] + jnp.sum(p, axis=-1, keepdims=True,
                                            dtype=jnp.float32)
        acc_sc[g] = alpha * acc_sc[g] + jnp.dot(
            p.astype(v.dtype), v[:, sl], preferred_element_type=jnp.float32)
        m_sc[g] = m_new

    @pl.when(ki == pl.num_programs(3) - 1)
    def _():
        for g in range(gh):
            sl = slice(g * hd, (g + 1) * hd)
            inv_l = pl.reciprocal(l_sc[g], approx=True)   # EUP, not VALU divide
            o_ref[:, sl] = (acc_sc[g] * inv_l).astype(o_ref.dtype)


def _flash_attention(qkv, *, batch, seq, heads, head_dim, group_heads,
                     q_tile, kv_tile, kv_valid, out_dtype, exp_dtype):
    rows, _ = qkv.shape                  # (B*S_p, 3C)
    C = heads * head_dim
    gh = group_heads
    HB = heads // gh
    tq, tk = q_tile, kv_tile
    qt, kt = seq // tq, seq // tk
    ghd = gh * head_dim
    needs_mask = (kv_valid != seq)

    kernel = functools.partial(
        _flash_kernel, gh=gh, hd=head_dim, kv_tile=tk, kv_valid=kv_valid,
        needs_mask=needs_mask, exp_dtype=exp_dtype)

    # qkv column layout: [ q heads | k heads | v heads ], each C wide.
    q_spec = pl.BlockSpec((tq, ghd), lambda b, h, qi, ki: (b * qt + qi, h))
    k_spec = pl.BlockSpec((tk, ghd), lambda b, h, qi, ki: (b * kt + ki, HB + h))
    # NOTE(v5e): K/V DMA may be exposed at ~820 GB/s; pipeline_mode=pl.Buffered(3)
    # on the k/v specs is a cheap (+~64 KB VMEM) latency-hiding option there.
    v_spec = pl.BlockSpec((tk, ghd), lambda b, h, qi, ki: (b * kt + ki, 2 * HB + h))
    o_spec = pl.BlockSpec((tq, ghd), lambda b, h, qi, ki: (b * qt + qi, h))

    block_bytes = (2 * tq * ghd + 2 * tk * ghd) * qkv.dtype.itemsize
    scratch_bytes = gh * tq * (head_dim + 2) * 4

    return pl.pallas_call(
        kernel,
        out_shape=jax.ShapeDtypeStruct((rows, C), out_dtype),
        grid_spec=pltpu.PrefetchScalarGridSpec(
            num_scalar_prefetch=0,
            grid=(batch, HB, qt, kt),
            in_specs=[q_spec, k_spec, v_spec],
            out_specs=o_spec,
            scratch_shapes=[
                pltpu.VMEM((gh, tq, 1), jnp.float32),          # running max m
                pltpu.VMEM((gh, tq, 1), jnp.float32),          # running sum l
                pltpu.VMEM((gh, tq, head_dim), jnp.float32),   # accumulators
            ],
        ),
        compiler_params=pltpu.CompilerParams(
            dimension_semantics=("parallel", "parallel", "parallel", "arbitrary"),
            vmem_limit_bytes=_vmem_limit(block_bytes, scratch_bytes)),
    )(qkv, qkv, qkv)


# ---------------------------------------------------------------------------
# One-time parameter prep (hoisted out of the per-call path):
#   * fold 1/sqrt(head_dim) into the q columns of w_in / b_in,
#   * cast weights to the matmul dtype once; biases stay f32.
# Weights are (in, out) = PyTorch weight.T; biases (1, out).
# ---------------------------------------------------------------------------
def prepare_params(w_in, b_in, w_out, b_out, heads, *, compute_dtype=jnp.bfloat16):
    C = w_out.shape[0]
    hd = C // heads
    scale = 1.0 / math.sqrt(hd)
    w_in = jnp.concatenate([w_in[:, :C] * scale, w_in[:, C:]], axis=1)
    b_in = jnp.concatenate([b_in[:, :C] * scale, b_in[:, C:]], axis=1)
    return {
        "heads": heads,
        "compute_dtype": compute_dtype,
        "w_in": w_in.astype(compute_dtype),
        "b_in": b_in.astype(jnp.float32),
        "w_out": w_out.astype(compute_dtype),
        "b_out": b_out.astype(jnp.float32),
    }


# ---------------------------------------------------------------------------
# Full module forward
# ---------------------------------------------------------------------------
def optimized_attention_pallas(x, params, *, q_tile=512, kv_tile=256,
                               row_tile=512, exp_dtype=jnp.bfloat16):
    """x: (B, S, C).  params from prepare_params."""
    B, S, C = x.shape
    heads = params["heads"]
    cd = params["compute_dtype"]
    assert C % heads == 0
    hd = C // heads

    # heads per flash block: smallest group whose channel width is a multiple
    # of 128 lanes -> unmasked stores and 128-wide PV matmuls.
    gh = 1
    for g in range(1, heads + 1):
        if heads % g == 0 and (g * hd) % 128 == 0:
            gh = g
            break
    # TODO(synk): if no group gives a 128-multiple width (e.g. hd=80 with few
    # heads), this falls back to gh=1 with sub-128-lane (masked-store) blocks.

    # Pad S so sequence tiles are lane/sublane friendly (handles ragged S like
    # 77 text tokens); padded keys are masked inside the kernel.
    S_p = _round_up(S, 128)
    if S_p != S:
        x = jnp.pad(x, ((0, 0), (0, S_p - S), (0, 0)))
    tq = _pick_tile(S_p, q_tile)
    tk = _pick_tile(S_p, kv_tile)

    x2 = x.reshape(B * S_p, C)           # contiguous reshape, no data movement

    # in_proj: row-tiled wide GEMM; x cast to bf16 inside the kernel; q columns
    # already carry the 1/sqrt(hd) scale.
    qkv = _linear(x2, params["w_in"], params["b_in"], out_dtype=cd,
                  row_tile=row_tile)     # (B*S_p, 3C)

    # flash attention reads q/k/v straight from the fused buffer and writes the
    # merged-head (B*S_p, C) result directly -> no head split/merge transposes.
    o = _flash_attention(qkv, batch=B, seq=S_p, heads=heads, head_dim=hd,
                         group_heads=gh, q_tile=tq, kv_tile=tk, kv_valid=S,
                         out_dtype=cd, exp_dtype=exp_dtype)

    out = _linear(o, params["w_out"], params["b_out"], out_dtype=x.dtype,
                  row_tile=row_tile)
    out = out.reshape(B, S_p, C)
    return out[:, :S, :] if S_p != S else out


# ---------------------------------------------------------------------------
# Pure-JAX reference mirroring the kernel's dtype policy (bf16 matmul inputs,
# bf16 exp, f32 accumulation), matching the PyTorch forward semantics.
# ---------------------------------------------------------------------------
def _reference(x, w_in, b_in, w_out, b_out, heads, *,
               compute_dtype=jnp.bfloat16, exp_dtype=jnp.bfloat16):
    B, S, C = x.shape
    hd = C // heads
    cd = compute_dtype
    f32 = jnp.float32
    scale = 1.0 / math.sqrt(hd)

    x2 = x.reshape(B * S, C).astype(cd)
    xp = (jnp.dot(x2, w_in.astype(cd), preferred_element_type=f32)
          + b_in.astype(f32)).astype(cd).reshape(B, S, 3 * C)
    q, k, v = xp[..., :C], xp[..., C:2 * C], xp[..., 2 * C:]

    def split_heads(t):
        return t.reshape(B, S, heads, hd).transpose(0, 2, 1, 3)   # (B,H,S,hd)

    qh, kh, vh = split_heads(q), split_heads(k), split_heads(v)
    qs = (qh.astype(f32) * scale).astype(cd)
    s = jnp.einsum("bhqd,bhkd->bhqk", qs, kh, preferred_element_type=f32)
    m = jnp.max(s, axis=-1, keepdims=True)
    p = jnp.exp((s - m).astype(exp_dtype)).astype(f32)
    p = p / jnp.sum(p, axis=-1, keepdims=True)
    o = jnp.einsum("bhqk,bhkd->bhqd", p.astype(cd), vh,
                   preferred_element_type=f32).astype(cd)
    o = o.transpose(0, 2, 1, 3).reshape(B * S, C)
    out = (jnp.dot(o, w_out.astype(cd), preferred_element_type=f32)
           + b_out.astype(f32))
    return out.astype(x.dtype).reshape(B, S, C)


def _run_case(key, B, S, C, heads, q_tile=512, kv_tile=256):
    kx, kwi, kbi, kwo, kbo = jax.random.split(key, 5)
    x = jax.random.normal(kx, (B, S, C), dtype=jnp.float32)
    # PyTorch Linear weights are (out, in); stored pre-transposed as (in, out).
    w_in = jax.random.normal(kwi, (C, 3 * C), dtype=jnp.float32) / math.sqrt(C)
    b_in = jax.random.normal(kbi, (1, 3 * C), dtype=jnp.float32) * 0.1
    w_out = jax.random.normal(kwo, (C, C), dtype=jnp.float32) / math.sqrt(C)
    b_out = jax.random.normal(kbo, (1, C), dtype=jnp.float32) * 0.1

    params = prepare_params(w_in, b_in, w_out, b_out, heads)
    out = optimized_attention_pallas(x, params, q_tile=q_tile, kv_tile=kv_tile)
    out = jax.block_until_ready(out)

    ref = _reference(x, w_in, b_in, w_out, b_out, heads)
    assert out.shape == (B, S, C)
    max_err = float(jnp.max(jnp.abs(out - ref)))
    assert jnp.allclose(out, ref, rtol=2e-2, atol=2e-2), \
        f"mismatch vs reference (B={B}, S={S}): max abs err {max_err}"


if __name__ == "__main__":
    key = jax.random.PRNGKey(0)
    k1, k2 = jax.random.split(key)
    # main config: tq=512 flash tiles, 128-lane (2-head) blocks, fused qkv layout
    _run_case(k1, B=2, S=512, C=128, heads=2)
    # ragged-S config exercising the padded/masked path (S=77 text tokens)
    _run_case(k2, B=2, S=77, C=128, heads=2)
    print("KERNEL_OK")
</pallas_src>

<mosaic_0001>
module attributes {stable_mosaic.version = 11 : i64} {
  func.func @_linear_kernel(%arg0: i32, %arg1: i32, %arg2: memref<512x128xf32, #tpu.memory_space<vmem>>, %arg3: memref<128x384xbf16, #tpu.memory_space<vmem>>, %arg4: memref<1x384xf32, #tpu.memory_space<vmem>>, %arg5: memref<512x384xbf16, #tpu.memory_space<vmem>>) attributes {dimension_semantics = [#tpu.dimension_semantics<parallel>, #tpu.dimension_semantics<parallel>], iteration_bounds = array<i64: 2, 1>, scalar_prefetch = 0 : i64, scratch_operands = 0 : i64, tpu.core_type = #tpu.core_type<tc>, window_params = [{transform_indices = @transform_0, window_bounds = array<i64: 512, 128>}, {transform_indices = @transform_1, window_bounds = array<i64: 128, 384>}, {transform_indices = @transform_2, window_bounds = array<i64: 1, 384>}, {transform_indices = @transform_3, window_bounds = array<i64: 512, 384>}]} {
    %c0 = arith.constant 0 : index
    %c0_0 = arith.constant 0 : index
    %0 = vector.load %arg2[%c0, %c0_0] : memref<512x128xf32, #tpu.memory_space<vmem>>, vector<512x128xf32>
    %1 = arith.truncf %0 : vector<512x128xf32> to vector<512x128xbf16>
    %c0_1 = arith.constant 0 : index
    %c0_2 = arith.constant 0 : index
    %2 = vector.load %arg3[%c0_1, %c0_2] : memref<128x384xbf16, #tpu.memory_space<vmem>>, vector<128x384xbf16>
    %cst = arith.constant dense<0.000000e+00> : vector<512x384xf32>
    %3 = tpu.matmul %1, %2, %cst {dimension_numbers = #tpu.dot_dimension_numbers<[1], [0], [0], [1], [0, 0, 1, 1], [], []>} : vector<512x128xbf16>, vector<128x384xbf16>, vector<512x384xf32> -> vector<512x384xf32>
    %c0_3 = arith.constant 0 : index
    %c0_4 = arith.constant 0 : index
    %4 = vector.load %arg4[%c0_3, %c0_4] : memref<1x384xf32, #tpu.memory_space<vmem>>, vector<1x384xf32>
    %5 = vector.broadcast %4 : vector<1x384xf32> to vector<512x384xf32>
    %6 = arith.addf %3, %5 : vector<512x384xf32>
    %7 = arith.truncf %6 : vector<512x384xf32> to vector<512x384xbf16>
    %c0_5 = arith.constant 0 : index
    %c0_6 = arith.constant 0 : index
    %8 = vector.load %arg5[%c0_5, %c0_6] : memref<512x384xbf16, #tpu.memory_space<vmem>>, vector<512x384xbf16>
    tpu.vector_store %arg5[%c0_5, %c0_6], %7 {strides = array<i32>} : memref<512x384xbf16, #tpu.memory_space<vmem>>, vector<512x384xbf16>,
    return
  }
  func.func @transform_0(%arg0: i32, %arg1: i32) -> (i32, i32) {
    %c0_i32 = arith.constant 0 : i32
    %c0_i32_0 = arith.constant 0 : i32
    return %arg0, %c0_i32 : i32, i32
  }
  func.func @transform_1(%arg0: i32, %arg1: i32) -> (i32, i32) {
    %c0_i32 = arith.constant 0 : i32
    %c0_i32_0 = arith.constant 0 : i32
    return %c0_i32, %arg1 : i32, i32
  }
  func.func @transform_2(%arg0: i32, %arg1: i32) -> (i32, i32) {
    %c0_i32 = arith.constant 0 : i32
    %c0_i32_0 = arith.constant 0 : i32
    return %c0_i32, %arg1 : i32, i32
  }
  func.func @transform_3(%arg0: i32, %arg1: i32) -> (i32, i32) {
    %c0_i32 = arith.constant 0 : i32
    return %arg0, %arg1 : i32, i32
  }
}

</mosaic_0001>

<bundles_post_ra>
// kernel: tpu_custom_call.1
= control target key start
LH: loop header
LB: loop body
LE: loop exit
PB: predicated region body
PF: predicated region fallthrough
CT: control target
= control target key end

     0   :  { %8 = vsyncpa [#allocation3], 0  ;;  %s3486_s0 = inlined_call_operand.hbm [shape: f32[1024,128], index: 0, kind: input, shape index: {}]   ;;  %s3487_s1 = inlined_call_operand.hbm [shape: bf16[128,384], index: 1, kind: input, shape index: {}]   ;;  %s3488_s2 = inlined_call_operand.vmem [shape: f32[1,384], index: 2, kind: input, shape index: {}]   ;;  %s3489_s3 = inlined_call_operand.hbm [shape: bf16[1024,384], index: 3, kind: output, shape index: {}]  }
   0x1   :  { %10 = vsyncpa [#allocation3 + $0x1], 0 }
   0x2   :  { %11 = vsyncpa [#allocation6], 0 }
   0x3   :  { %12 = vsyncpa [#allocation4], 0 }
   0x4   :  { %14 = vsyncpa [#allocation4 + $0x1], 0  ;;  %s2782_s12 = smov 0   ;;  %s2784_s13 = smov 0  }
   0x5   :  { %s2786_s14 = smov 0   ;;  %s2788_s15 = smov 0  }
   0x6   :  { %s2790_s16 = smov 0   ;;  %s2792_s17 = smov 0  }
   0x7 LB: > { %s2058_s18 = sadd.s32 4294967295, %s2750_s17   ;;  %s2059_s19 = sadd.s32 4294967294, %s2750_s17   ;;  %s2750_s17 = sphi %s2792_s17, %s20_s17   ;;  %s2746_s16 = sphi %s2790_s16, %s3513_s16   ;;  %s2742_s15 = sphi %s2788_s15, %s3512_s15   ;;  %s2738_s14 = sphi %s2786_s14, %s3511_s14   ;;  %s2734_s13 = sphi %s2784_s13, %s3510_s13   ;;  %s2730_s12 = sphi %s2782_s12, %s3509_s12  }
   0x8   : > { %p52_p0 = scmp.ne.s32.totalorder %s2734_s13, %s2730_s12  ;;  %p2816_p1 = scmp.eq.s32.totalorder %s2058_s18, 0 }
   0x9   : > { %p2820_p2 = scmp.eq.s32.totalorder %s2058_s18, 1  ;;  %p136_p3 = scmp.eq.s32.totalorder %s2059_s19, 1 }
   0xa   : > { %s3494_s20 = scalar_select %p2816_p1, 1, 0 }
   0xb   : > { %s3495_s21 = scalar_select %p2820_p2, 1, 0 }
   0xc   : > { %p2826_p4 = por %p2816_p1, %p52_p0  ;;  %p2060_p5 = scmp.ge.s32.totalorder %s2750_s17, 1 }
   0xd   : > { %p2831_p6 = por %p136_p3, %p52_p0  ;;  %p143_p7 = scmp.lt.s32.totalorder %s2750_s17, 3 }
   0xe   : > { %s3496_s22 = scalar_select %p2826_p4, 1, 0 }
   0xf   : > { %s3497_s23 = scalar_select %p2831_p6, 1, 0 }
  0x10   : > { %p2836_p8 = pnand %p2060_p5, %p143_p7  ;;  %s2752_s25 = smov [#allocation5]  }
  0x11   : > { %s158_s26 = sshll.u32 %s2752_s25, 4  ;;  %s32_s28 = sadd.s32 1, %s2746_s16  ;;  %s159_s26 = int_to_ptr.vmem [resolvable:$true] %s158_s26 }
  0x12   : > { %s3498_s24 = scalar_select %p2836_p8, 1, 0 }
  0x13   : > { %p2502_p9 = pneg %p2836_p8  ;;  %s2606_s4 = scalar_lea.hbm %s3487_s1, 3072 }
  0x14   : > { %p2607_p12 = scmp.ne.s32.totalorder %s3487_s1, %s2606_s4  ;;  %p2613_p5 = scmp.lt.u32.totalorder %s2606_s4, %s3487_s1 }
  0x15   : > { %p2845_p11 = pnand %p2502_p9, %p2816_p1 }
  0x17   : > { %p2608_p13 = pneg %p2845_p11 }
  0x19   : > { %p2609_p0 = pnand %p2608_p13, %p2607_p12 }
  0x1b   : > { %p2610_p3 = pneg %p2609_p0 }
  0x1d   : > { %p2615_p7 = pnand %p2613_p5, %p2610_p3 }
  0x1f   : > { %2618 = shalt.err (!%p2615_p7)
}
  0x20   : > { %s2619_s9 = scalar_lea.vmem %s159_s26, 3072  ;;  %p2627_p1 = scmp.lt.s32.totalorder %s159_s26, %s159_s26 }
  0x21   : > { %p2620_p9 = scmp.ne.s32.totalorder %s159_s26, %s2619_s9  ;;  %p2628_p4 = scmp.lt.s32.totalorder %s2619_s9, %s2619_s9 }
  0x23   : > { %p2622_p10 = pnand %p2620_p9, %p2608_p13  ;;  %p2629_p8 = por %p2628_p4, %p2627_p1 }
  0x25   : > { %p2623_p6 = pneg %p2622_p10 }
  0x27   : > { %p2630_p2 = pnand %p2629_p8, %p2623_p6 }
  0x29   : > { %2633 = shalt.err (!%p2630_p2)
}
  0x2a   : > { %s2753_s10 = smov 192   ;;  %s2754_s11 = smov 12  }
  0x2b   : > { %2505 = dma.hbm_to_vmem [thread:$0]  (!%p2845_p11), %s3487_s1, 3072, %s159_s26, [#allocation6], %s2753_s10, %s2753_s10, %s2754_s11  }
  0x2c   : > { %p34_p1 = scmp.ge.s32.totalorder %s32_s28, 2  ;;  %s39_s25 = sadd.s32 1, %s2738_s14 }
  0x2d   : > { %p46_p2 = scmp.ne.s32.totalorder %s2738_s14, %s2734_s13  ;;  %p47_p4 = scmp.eq.s32.totalorder %s2750_s17, 0 }
  0x2e   : > { %s3515_s28 = smov (%p34_p1, %s32_s28), 0  ;;  %p3501_p8 = scmp.ne.s32.totalorder %s3495_s21, 0 }
  0x2f   : > { %p2872_p6 = por %p47_p4, %p46_p2  ;;  %s36_s27 = ssub.s32 %s2746_s16, %s3515_s28 }
  0x30   : > { %p2878_p10 = por %p3501_p8, %p46_p2  ;;  %p2515_p12 = scmp.lt.s32.totalorder %s2750_s17, 2 }
  0x31   : > { %p37_p11 = scmp.eq.s32.totalorder %s36_s27, 0  ;;  %s180_s26 = sand.u32 1, %s2738_s14  }
  0x32   : > { %s2064_s4 = sshll.u32 %s180_s26, 9  ;;  %s2227_s6 = sshll.u32 %s2746_s16, 13 }
  0x33   : > { %s2887_s5 = scalar_select %p37_p11, %s2738_s14, %s39_s25  }
  0x34   : > { %s2893_s9 = scalar_lea.hbm %s3486_s0, %s2227_s6  ;;  %s184_s21 = scalar_lea.vmem [#allocation2], %s2064_s4 }
  0x35   : > { %s191_s10 = sshll.u32 %s184_s21, 4  ;;  %p2899_p13 = pnand %p2515_p12, %p2872_p6  ;;  %s2895_s10 = int_to_ptr.vmem [resolvable:$true] %s191_s10 }
  0x36   : > { %s2903_s18 = scalar_lea.sflag [#allocation3], %s180_s26  ;;  %s2634_s19 = scalar_lea.hbm %s2893_s9, 8192 }
  0x37   : > { %p2635_p0 = scmp.ne.s32.totalorder %s2893_s9, %s2634_s19  ;;  %p2636_p3 = pneg %p2899_p13 }
  0x38   : > { %s2639_s29 = scalar_lea.hbm %s3486_s0, 16384  ;;  %p2640_p9 = scmp.lt.u32.totalorder %s2893_s9, %s3486_s0 }
  0x39   : > { %p2637_p5 = pnand %p2636_p3, %p2635_p0  ;;  %p2641_p1 = scmp.lt.u32.totalorder %s2639_s29, %s2634_s19 }
  0x3a   : > { %p2643_p4 = scmp.lt.u32.totalorder %s2634_s19, %s2893_s9 }
  0x3b   : > { %p2638_p7 = pneg %p2637_p5  ;;  %p2642_p2 = por %p2641_p1, %p2640_p9 }
  0x3d   : > { %p2644_p6 = por %p2643_p4, %p2642_p2 }
  0x3f   : > { %p2645_p8 = pnand %p2644_p6, %p2638_p7 }
  0x41   : > { %2648 = shalt.err (!%p2645_p8)
}
  0x42   : > { %s2649_s26 = scalar_lea.vmem %s2895_s10, 8192  ;;  %s2755_s7 = smov [#allocation2]  }
  0x43   : > { %p2650_p12 = scmp.ne.s32.totalorder %s2895_s10, %s2649_s26  ;;  %s2654_s8 = sshll.u32 %s2755_s7, 4  ;;  %s2655_s8 = int_to_ptr.vmem [resolvable:$false] %s2654_s8 }
  0x44   : > { %s2656_s21 = scalar_lea.vmem %s2655_s8, 16384  ;;  %p2657_p5 = scmp.lt.s32.totalorder %s2895_s10, %s2655_s8 }
  0x45   : > { %p2652_p11 = pnand %p2650_p12, %p2636_p3  ;;  %p2658_p9 = scmp.lt.s32.totalorder %s2656_s21, %s2649_s26 }
  0x47   : > { %p2653_p0 = pneg %p2652_p11  ;;  %p2659_p1 = por %p2658_p9, %p2657_p5 }
  0x49   : > { %p2660_p2 = pnand %p2659_p1, %p2653_p0 }
  0x4b   : > { %2663 = shalt.err (!%p2660_p2)
}
  0x4c   : > { %s2756_s19 = smov 128   ;;  %s2757_s25 = smov 8  }
  0x4d   : > { %2509 = dma.hbm_to_vmem [thread:$0]  (!%p2899_p13), %s2893_s9, 8192, %s2895_s10, %s2903_s18, %s2756_s19, %s2756_s19, %s2757_s25  }
  0x4e   : > { %p3504_p3 = scmp.ne.s32.totalorder %s3498_s24, 0 }
  0x4f   : > { %s2934_s27 = sand.u32 (!%p3504_p3), 1, %s2734_s13   ;;  %p3505_p7 = scmp.ne.s32.totalorder (!%p3504_p3), %s3496_s22, 0 }
  0x50   : > { %203 = sbr.rel (%p3504_p3) target bundleno = 543 (0x21f), region = 32  ;;  %s2068_s29 = sshll.u32 (!%p3504_p3), %s2934_s27, 9 }
  0x51   : > { %s206_s4 = scalar_lea.sflag (!%p3504_p3), [#allocation3], %s2934_s27  ;;  %s2938_s6 = scalar_lea.vmem (!%p3504_p3), [#allocation2], %s2068_s29 }
  0x57   : > { %2717 = dma.done.wait (%p3505_p7), %s206_s4, 8192  }
  0x58   : > { %2719 = vsyncadd (%p3505_p7), %s206_s4, 4294959104  ;;  %p3506_p13 = scmp.ne.s32.totalorder %s3494_s20, 0 }
  0x5a   : > { %2721 = dma.done.wait (%p3506_p13), [#allocation6], 3072  }
  0x5b   : > { %2723 = vsyncadd (%p3506_p13), [#allocation6], 4294964224  ;;  %v2758_v0 = vmov 0   ;;  %v2574_v1 = vld [vmem:[#allocation5 + $0x4] ss:$12 sps:$4 sm:$0xff]   ;;  %v251_v18 = vld [vmem:[%s2938_s6 + $0x8] sm:$0xff] }
  0x5c   : > { %555 = vmatprep.mubr.bf16.mxu0 %v2758_v0  ;;  %795 = vmatprep.mubr.bf16.mxu1 %v2758_v0  ;;  %v2576_v2 = vld [vmem:[#allocation5] ss:$12 sps:$4 sm:$0xff]   ;;  %v2577_v3 = vld [vmem:[#allocation5 + $0x1c] ss:$12 sps:$4 sm:$0xff]   ;;  %v2579_v4 = vld [vmem:[#allocation5 + $0x18] ss:$12 sps:$4 sm:$0xff]  }
  0x5d   : > { %523 = vmatprep.subr.bf16.mxu0 %v2574_v1  ;;  %2476 = vmatprep.subr.bf16.mxu1 %v2574_v1  ;;  %v2580_v5 = vld [vmem:[#allocation5 + $0x34] ss:$12 sps:$4 sm:$0xff]   ;;  %v2582_v6 = vld [vmem:[#allocation5 + $0x30] ss:$12 sps:$4 sm:$0xff]   ;;  %v2583_v7 = vld [vmem:[#allocation5 + $0x4c] ss:$12 sps:$4 sm:$0xff]  }
  0x5e   : > { %524 = vmatpush1.bf16.msra.mxu0 %v2576_v2  ;;  %2484 = vmatpush1.bf16.msra.mxu1 %v2576_v2  ;;  %v2585_v8 = vld [vmem:[#allocation5 + $0x48] ss:$12 sps:$4 sm:$0xff]   ;;  %v2586_v9 = vld [vmem:[#allocation5 + $0x64] ss:$12 sps:$4 sm:$0xff]   ;;  %v2588_v10 = vld [vmem:[#allocation5 + $0x60] ss:$12 sps:$4 sm:$0xff]  }
  0x5f   : > { %525 = vmatprep.subr.bf16.mxu0 %v2577_v3  ;;  %2477 = vmatprep.subr.bf16.mxu1 %v2577_v3  ;;  %v2589_v11 = vld [vmem:[#allocation5 + $0x7c] ss:$12 sps:$4 sm:$0xff]   ;;  %v2591_v12 = vld [vmem:[#allocation5 + $0x78] ss:$12 sps:$4 sm:$0xff]   ;;  %v2592_v13 = vld [vmem:[#allocation5 + $0x94] ss:$12 sps:$4 sm:$0xff]  }
  0x60   : > { %v2594_v14 = vld [vmem:[#allocation5 + $0x90] ss:$12 sps:$4 sm:$0xff]   ;;  %v2595_v15 = vld [vmem:[#allocation5 + $0xac] ss:$12 sps:$4 sm:$0xff]   ;;  %v2597_v16 = vld [vmem:[#allocation5 + $0xa8] ss:$12 sps:$4 sm:$0xff]  }
  0x61   : > { %v250_v17 = vld [vmem:[%s2938_s6] sm:$0xff]  ;;  %v299_v20 = vld [vmem:[%s2938_s6 + $0x188] sm:$0xff]  ;;  %v252_v25 = vld [vmem:[%s2938_s6 + $0x10] sm:$0xff]  ;;  %s2492_s24 = smul.u32 768, %s2934_s27  ;;  %s1934_s7 = scalar_lea.sflag [#allocation4], %s2934_s27 }
  0x62   : > { %526 = vmatpush1.bf16.msra.mxu0 %v2579_v4  ;;  %2485 = vmatpush1.bf16.msra.mxu1 %v2579_v4  ;;  %v298_v19 = vld [vmem:[%s2938_s6 + $0x180] sm:$0xff]  ;;  %v2598_v21 = vld [vmem:[#allocation5 + $0x8] ss:$12 sps:$4 sm:$0xff]   ;;  %v2954_v22 = vpack.c.bf16 %v251_v18, %v250_v17  ;;  %v253_v26 = vld [vmem:[%s2938_s6 + $0x18] sm:$0xff]  ;;  %s2493_s10 = smul.u32 12288, %s2742_s15  ;;  %s2759_s21 = smov [#allocation7]  }
  0x63   : > { %527 = vmatprep.subr.bf16.mxu0 %v2580_v5  ;;  %2478 = vmatprep.subr.bf16.mxu1 %v2580_v5  ;;  %v2956_v23 = vpack.c.bf16 %v299_v20, %v298_v19  ;;  %v2599_v24 = vld [vmem:[#allocation5 + $0x20] ss:$12 sps:$4 sm:$0xff]   ;;  %v300_v27 = vld [vmem:[%s2938_s6 + $0x190] sm:$0xff]  ;;  %v301_v28 = vld [vmem:[%s2938_s6 + $0x198] sm:$0xff]  ;;  %v2966_v30 = vpack.c.bf16 %v253_v26, %v252_v25  ;;  %s3112_s9 = scalar_lea.vmem [#allocation7], %s2492_s24  ;;  %s2668_s19 = sshll.u32 %s2759_s21, 4  ;;  %s2669_s19 = int_to_ptr.vmem [resolvable:$false] %s2668_s19 }
  0x64   : > { %v2600_v29 = vld [vmem:[#allocation5 + $0x38] ss:$12 sps:$4 sm:$0xff]   ;;  %v2968_v31 = vpack.c.bf16 %v301_v28, %v300_v27  ;;  %v2601_v32 = vld [vmem:[#allocation5 + $0x50] ss:$12 sps:$4 sm:$0xff]   ;;  %v255_v34 = vld [vmem:[%s2938_s6 + $0x28] sm:$0xff]  ;;  %s1950_s11 = sshll.u32 %s3112_s9, 4  ;;  %s3430_s26 = scalar_lea.hbm %s3489_s3, %s2493_s10  ;;  %s3432_s11 = int_to_ptr.vmem [resolvable:$true] %s1950_s11 }
  0x65   : > { %v254_v33 = vld [vmem:[%s2938_s6 + $0x20] sm:$0xff]  ;;  %v303_v36 = vld [vmem:[%s2938_s6 + $0x1a8] sm:$0xff]  ;;  %v256_v41 = vld [vmem:[%s2938_s6 + $0x30] sm:$0xff]  ;;  %s2664_s8 = scalar_lea.vmem %s3432_s11, 12288  ;;  %s2670_s25 = scalar_lea.vmem %s2669_s19, 24576 }
  0x66   : > { %528 = vmatpush1.bf16.msra.mxu0 %v2582_v6  ;;  %2486 = vmatpush1.bf16.msra.mxu1 %v2582_v6  ;;  %v302_v35 = vld [vmem:[%s2938_s6 + $0x1a0] sm:$0xff]  ;;  %v2602_v37 = vld [vmem:[#allocation5 + $0x68] ss:$12 sps:$4 sm:$0xff]   ;;  %v2978_v38 = vpack.c.bf16 %v255_v34, %v254_v33  ;;  %v257_v42 = vld [vmem:[%s2938_s6 + $0x38] sm:$0xff]  ;;  %p2665_p4 = scmp.ne.s32.totalorder %s3432_s11, %s2664_s8  ;;  %p2671_p12 = scmp.lt.s32.totalorder %s3432_s11, %s2669_s19 }
  0x67   : > { %529 = vmatprep.subr.bf16.mxu0 %v2583_v7  ;;  %2479 = vmatprep.subr.bf16.mxu1 %v2583_v7  ;;  %v2980_v39 = vpack.c.bf16 %v303_v36, %v302_v35  ;;  %v2603_v40 = vld [vmem:[#allocation5 + $0x80] ss:$12 sps:$4 sm:$0xff]   ;;  %v304_v43 = vld [vmem:[%s2938_s6 + $0x1b0] sm:$0xff]  ;;  %v305_v44 = vld [vmem:[%s2938_s6 + $0x1b8] sm:$0xff]  ;;  %v317_v46 = vpack.c.bf16 %v257_v42, %v256_v41  ;;  %p2672_p11 = scmp.lt.s32.totalorder %s2670_s25, %s2664_s8 }
  0x68   : > { %v2604_v45 = vld [vmem:[#allocation5 + $0x98] ss:$12 sps:$4 sm:$0xff]   ;;  %v2990_v47 = vpack.c.bf16 %v305_v44, %v304_v43  ;;  %v2605_v48 = vld [vmem:[#allocation5 + $0xb0] ss:$12 sps:$4 sm:$0xff]   ;;  %v259_v50 = vld [vmem:[%s2938_s6 + $0x48] sm:$0xff]  ;;  %p2666_p6 = pnand %p2665_p4, %p2878_p10 }
  0x69   : > { %v258_v49 = vld [vmem:[%s2938_s6 + $0x40] sm:$0xff]  ;;  %v307_v52 = vld [vmem:[%s2938_s6 + $0x1c8] sm:$0xff]  ;;  %v260_v55 = vld [vmem:[%s2938_s6 + $0x50] sm:$0xff]  ;;  %p2673_p0 = por %p2672_p11, %p2671_p12 }
  0x6a   : > { %530 = vmatpush1.bf16.msra.mxu0 %v2585_v8  ;;  %2487 = vmatpush1.bf16.msra.mxu1 %v2585_v8  ;;  %v306_v51 = vld [vmem:[%s2938_s6 + $0x1c0] sm:$0xff]  ;;  %v318_v53 = vpack.c.bf16 %v259_v50, %v258_v49  ;;  %v261_v56 = vld [vmem:[%s2938_s6 + $0x58] sm:$0xff]  ;;  %v308_v57 = vld [vmem:[%s2938_s6 + $0x1d0] sm:$0xff]  ;;  %p2667_p8 = pneg %p2666_p6 }
  0x6b   : > { %531 = vmatprep.subr.bf16.mxu0 %v2586_v9  ;;  %2480 = vmatprep.subr.bf16.mxu1 %v2586_v9  ;;  %v2999_v54 = vpack.c.bf16 %v307_v52, %v306_v51  ;;  %v309_v58 = vld [vmem:[%s2938_s6 + $0x1d8] sm:$0xff]  ;;  %v319_v59 = vpack.c.bf16 %v261_v56, %v260_v55  ;;  %v262_v61 = vld [vmem:[%s2938_s6 + $0x60] sm:$0xff]  ;;  %v263_v62 = vld [vmem:[%s2938_s6 + $0x68] sm:$0xff] }
  0x6c   : > { %v3008_v60 = vpack.c.bf16 %v309_v58, %v308_v57  ;;  %v310_v63 = vld [vmem:[%s2938_s6 + $0x1e0] sm:$0xff]  ;;  %v311_v1 = vld [vmem:[%s2938_s6 + $0x1e8] sm:$0xff]  ;;  %v320_v2 = vpack.c.bf16 %v263_v62, %v262_v61  ;;  %v264_v4 = vld [vmem:[%s2938_s6 + $0x70] sm:$0xff]  ;;  %p2674_p5 = pnand %p2673_p0, %p2667_p8 }
  0x6d   : > { %v3017_v3 = vpack.c.bf16 %v311_v1, %v310_v63  ;;  %v265_v5 = vld [vmem:[%s2938_s6 + $0x78] sm:$0xff]  ;;  %v312_v6 = vld [vmem:[%s2938_s6 + $0x1f0] sm:$0xff]  ;;  %v271_v17 = vld [vmem:[%s2938_s6 + $0xa8] sm:$0xff] }
  0x6e   : > { %532 = vmatpush1.bf16.msra.mxu0 %v2588_v10  ;;  %2488 = vmatpush1.bf16.msra.mxu1 %v2588_v10  ;;  %v313_v7 = vld [vmem:[%s2938_s6 + $0x1f8] sm:$0xff]  ;;  %v321_v8 = vpack.c.bf16 %v265_v5, %v264_v4  ;;  %v266_v10 = vld [vmem:[%s2938_s6 + $0x80] sm:$0xff]  ;;  %v272_v19 = vld [vmem:[%s2938_s6 + $0xb0] sm:$0xff] }
  0x6f   : > { %533 = vmatprep.subr.bf16.mxu0 %v2589_v11  ;;  %2481 = vmatprep.subr.bf16.mxu1 %v2589_v11  ;;  %v3026_v9 = vpack.c.bf16 %v313_v7, %v312_v6  ;;  %v267_v11 = vld [vmem:[%s2938_s6 + $0x88] sm:$0xff]  ;;  %v273_v20 = vld [vmem:[%s2938_s6 + $0xb8] sm:$0xff]  ;;  %v276_v26 = vld [vmem:[%s2938_s6 + $0xd0] sm:$0xff] }
  0x70   : > { %v277_v27 = vld [vmem:[%s2938_s6 + $0xd8] sm:$0xff]  ;;  %v280_v33 = vld [vmem:[%s2938_s6 + $0xf0] sm:$0xff]  ;;  %v282_v35 = vld [vmem:[%s2938_s6 + $0x100] sm:$0xff] }
  0x71   : > { %v327_v28 = vpack.c.bf16 %v277_v27, %v276_v26  ;;  %v281_v34 = vld [vmem:[%s2938_s6 + $0xf8] sm:$0xff]  ;;  %v283_v36 = vld [vmem:[%s2938_s6 + $0x108] sm:$0xff]  ;;  %v286_v42 = vld [vmem:[%s2938_s6 + $0x120] sm:$0xff] }
  0x72   : > { %534 = vmatpush1.bf16.msra.mxu0 %v2591_v12  ;;  %2489 = vmatpush1.bf16.msra.mxu1 %v2591_v12  ;;  %v322_v12 = vpack.c.bf16 %v267_v11, %v266_v10  ;;  %v285_v41 = vld [vmem:[%s2938_s6 + $0x118] sm:$0xff]  ;;  %v287_v43 = vld [vmem:[%s2938_s6 + $0x128] sm:$0xff]  ;;  %v290_v49 = vld [vmem:[%s2938_s6 + $0x140] sm:$0xff] }
  0x73   : > { %535 = vmatprep.subr.bf16.mxu0 %v2592_v13  ;;  %2482 = vmatprep.subr.bf16.mxu1 %v2592_v13  ;;  %v268_v13 = vld [vmem:[%s2938_s6 + $0x90] sm:$0xff]  ;;  %v291_v50 = vld [vmem:[%s2938_s6 + $0x148] sm:$0xff]  ;;  %v293_v55 = vld [vmem:[%s2938_s6 + $0x158] sm:$0xff] }
  0x74   : > { %v334_v52 = vpack.c.bf16 %v291_v50, %v290_v49  ;;  %v294_v56 = vld [vmem:[%s2938_s6 + $0x160] sm:$0xff]  ;;  %v295_v57 = vld [vmem:[%s2938_s6 + $0x168] sm:$0xff]  ;;  %v296_v61 = vld [vmem:[%s2938_s6 + $0x170] sm:$0xff] }
  0x75   : > { %v297_v62 = vld [vmem:[%s2938_s6 + $0x178] sm:$0xff] }
  0x76   : > { %536 = vmatpush1.bf16.msra.mxu0 %v2594_v14  ;;  %2490 = vmatpush1.bf16.msra.mxu1 %v2594_v14  ;;  %v269_v14 = vld [vmem:[%s2938_s6 + $0x98] sm:$0xff]  ;;  %v337_v63 = vpack.c.bf16 %v297_v62, %v296_v61 }
  0x77   : > { %537 = vmatprep.subr.bf16.mxu0 %v2595_v15  ;;  %2483 = vmatprep.subr.bf16.mxu1 %v2595_v15  ;;  %v323_v15 = vpack.c.bf16 %v269_v14, %v268_v13 }
  0x7a   : > { %538 = vmatpush1.bf16.msra.mxu0 %v2597_v16  ;;  %2491 = vmatpush1.bf16.msra.mxu1 %v2597_v16  ;;  %v270_v16 = vld [vmem:[%s2938_s6 + $0xa0] sm:$0xff] }
  0x7b   : > { %2396 = vmatprep.subr.bf16.mxu1 %v2598_v21  ;;  %v324_v18 = vpack.c.bf16 %v271_v17, %v270_v16 }
  0x7d   : > { %556 = vmatmul.mubr.bf16.vlgmr.msra.gmra.mrb[0].mxu0 %v2954_v22  ;;  %796 = vmatmul.mubr.bf16.vlgmr.msra.gmra.mrb[0].mxu1 %v2956_v23 }
  0x7e   : > { %2397 = vmatpush3.bf16.msra.mxu1 %v2598_v21  ;;  %565 = vmatprep.mubr.bf16.mxu0 %v2758_v0  ;;  %v325_v21 = vpack.c.bf16 %v273_v20, %v272_v19 }
  0x7f   : > { %805 = vmatprep.mubr.bf16.mxu1 %v2758_v0  ;;  %2398 = vmatprep.subr.bf16.mxu1 %v2599_v24 }
  0x82   : > { %2399 = vmatpush3.bf16.msra.mxu1 %v2599_v24  ;;  %v275_v24 = vld [vmem:[%s2938_s6 + $0xc8] sm:$0xff] }
  0x83   : > { %2400 = vmatprep.subr.bf16.mxu1 %v2600_v29 }
  0x85   : > { %566 = vmatmul.mubr.bf16.gmra.mrb[4].mxu0 %v2966_v30  ;;  %806 = vmatmul.mubr.bf16.gmra.mrb[4].mxu1 %v2968_v31 }
  0x86   : > { %575 = vmatprep.mubr.bf16.mxu0 %v2758_v0  ;;  %815 = vmatprep.mubr.bf16.mxu1 %v2758_v0 }
  0x87   : > { %2401 = vmatpush3.bf16.msra.mxu1 %v2600_v29  ;;  %v278_v29 = vld [vmem:[%s2938_s6 + $0xe0] sm:$0xff] }
  0x88   : > { %2402 = vmatprep.subr.bf16.mxu1 %v2601_v32 }
  0x8b   : > { %2403 = vmatpush3.bf16.msra.mxu1 %v2601_v32 }
  0x8c   : > { %2404 = vmatprep.subr.bf16.mxu1 %v2602_v37 }
  0x8d   : > { %576 = vmatmul.mubr.bf16.gmra.mrb[8].mxu0 %v2978_v38  ;;  %816 = vmatmul.mubr.bf16.gmra.mrb[8].mxu1 %v2980_v39 }
  0x8e   : > { %585 = vmatprep.mubr.bf16.mxu0 %v2758_v0  ;;  %825 = vmatprep.mubr.bf16.mxu1 %v2758_v0 }
  0x8f   : > { %2405 = vmatpush3.bf16.msra.mxu1 %v2602_v37  ;;  %v329_v37 = vpack.c.bf16 %v281_v34, %v280_v33 }
  0x90   : > { %2406 = vmatprep.subr.bf16.mxu1 %v2603_v40 }
  0x93   : > { %2407 = vmatpush3.bf16.msra.mxu1 %v2603_v40  ;;  %v284_v40 = vld [vmem:[%s2938_s6 + $0x110] sm:$0xff] }
  0x94   : > { %2408 = vmatprep.subr.bf16.mxu1 %v2604_v45  ;;  %v331_v44 = vpack.c.bf16 %v285_v41, %v284_v40 }
  0x95   : > { %586 = vmatmul.mubr.bf16.gmra.mrb[12].mxu0 %v317_v46  ;;  %826 = vmatmul.mubr.bf16.gmra.mrb[12].mxu1 %v2990_v47 }
  0x96   : > { %595 = vmatprep.mubr.bf16.mxu0 %v2758_v0  ;;  %835 = vmatprep.mubr.bf16.mxu1 %v2758_v0 }
  0x97   : > { %2409 = vmatpush3.bf16.msra.mxu1 %v2604_v45  ;;  %v332_v45 = vpack.c.bf16 %v287_v43, %v286_v42 }
  0x98   : > { %2410 = vmatprep.subr.bf16.mxu1 %v2605_v48 }
  0x9b   : > { %2411 = vmatpush3.bf16.msra.mxu1 %v2605_v48  ;;  %v289_v48 = vld [vmem:[%s2938_s6 + $0x138] sm:$0xff] }
  0x9d   : > { %596 = vmatmul.mubr.bf16.gmra.mrb[16].mxu0 %v318_v53  ;;  %836 = vmatmul.mubr.bf16.gmra.mrb[16].mxu1 %v2999_v54 }
  0x9e   : > { %605 = vmatprep.mubr.bf16.mxu0 %v2758_v0  ;;  %845 = vmatprep.mubr.bf16.mxu1 %v2758_v0 }
  0xa5   : > { %606 = vmatmul.mubr.bf16.gmra.mrb[20].mxu0 %v319_v59  ;;  %846 = vmatmul.mubr.bf16.gmra.mrb[20].mxu1 %v3008_v60 }
  0xa6   : > { %615 = vmatprep.mubr.bf16.mxu0 %v2758_v0  ;;  %855 = vmatprep.mubr.bf16.mxu1 %v2758_v0 }
  0xad   : > { %616 = vmatmul.mubr.bf16.gmra.mrb[24].mxu0 %v320_v2  ;;  %856 = vmatmul.mubr.bf16.gmra.mrb[24].mxu1 %v3017_v3 }
  0xae   : > { %625 = vmatprep.mubr.bf16.mxu0 %v2758_v0  ;;  %865 = vmatprep.mubr.bf16.mxu1 %v2758_v0 }
  0xb5   : > { %626 = vmatmul.mubr.bf16.gmra.mrb[28].mxu0 %v321_v8  ;;  %866 = vmatmul.mubr.bf16.gmra.mrb[28].mxu1 %v3026_v9 }
  0xb6   : > { %635 = vmatprep.mubr.bf16.mxu0 %v2758_v0  ;;  %2412 = vmatprep.mubr.bf16.mxu1 %v2954_v22  ;;  %v274_v22 = vld [vmem:[%s2938_s6 + $0xc0] sm:$0xff] }
  0xb7   : > { %v326_v25 = vpack.c.bf16 %v275_v24, %v274_v22 }
  0xbd   : > { %636 = vmatmul.mubr.bf16.gmra.mrb[32].mxu0 %v322_v12  ;;  %2413 = vmatmul.mubr.bf16.vlgmr.msra.gmra.mrb[32].mxu1 %v2966_v30  ;;  %v279_v30 = vld [vmem:[%s2938_s6 + $0xe8] sm:$0xff] }
  0xbe   : > { %645 = vmatprep.mubr.bf16.mxu0 %v2758_v0  ;;  %2416 = vmatprep.mubr.bf16.mxu1 %v2978_v38  ;;  %v328_v32 = vpack.c.bf16 %v279_v30, %v278_v29  ;;  %v330_v38 = vpack.c.bf16 %v283_v36, %v282_v35 }
  0xc5   : > { %646 = vmatmul.mubr.bf16.gmra.mrb[36].mxu0 %v323_v15  ;;  %2417 = vmatmul.mubr.bf16.gmra.mrb[36].mxu1 %v317_v46  ;;  %v288_v46 = vld [vmem:[%s2938_s6 + $0x130] sm:$0xff] }
  0xc6   : > { %655 = vmatprep.mubr.bf16.mxu0 %v2758_v0  ;;  %2420 = vmatprep.mubr.bf16.mxu1 %v318_v53  ;;  %v333_v51 = vpack.c.bf16 %v289_v48, %v288_v46  ;;  %v292_v53 = vld [vmem:[%s2938_s6 + $0x150] sm:$0xff] }
  0xc7   : > { %v335_v58 = vpack.c.bf16 %v293_v55, %v292_v53 }
  0xcd   : > { %656 = vmatmul.mubr.bf16.gmra.mrb[40].mxu0 %v324_v18  ;;  %2421 = vmatmul.mubr.bf16.gmra.mrb[40].mxu1 %v319_v59  ;;  %v336_v59 = vpack.c.bf16 %v295_v57, %v294_v56 }
  0xce   : > { %665 = vmatprep.mubr.bf16.mxu0 %v2758_v0  ;;  %2424 = vmatprep.mubr.bf16.mxu1 %v320_v2 }
  0xd5   : > { %666 = vmatmul.mubr.bf16.gmra.mrb[44].mxu0 %v325_v21  ;;  %2425 = vmatmul.mubr.bf16.gmra.mrb[44].mxu1 %v321_v8 }
  0xd6   : > { %675 = vmatprep.mubr.bf16.mxu0 %v2758_v0  ;;  %2428 = vmatprep.mubr.bf16.mxu1 %v322_v12 }
  0xdd   : > { %676 = vmatmul.mubr.bf16.gmra.mrb[48].mxu0 %v326_v25  ;;  %2429 = vmatmul.mubr.bf16.gmra.mrb[48].mxu1 %v323_v15 }
  0xde   : > { %685 = vmatprep.mubr.bf16.mxu0 %v2758_v0  ;;  %2432 = vmatprep.mubr.bf16.mxu1 %v324_v18 }
  0xe5   : > { %686 = vmatmul.mubr.bf16.gmra.mrb[52].mxu0 %v327_v28  ;;  %2433 = vmatmul.mubr.bf16.gmra.mrb[52].mxu1 %v325_v21 }
  0xe6   : > { %695 = vmatprep.mubr.bf16.mxu0 %v2758_v0  ;;  %2436 = vmatprep.mubr.bf16.mxu1 %v326_v25 }
  0xed   : > { %696 = vmatmul.mubr.bf16.gmra.mrb[56].mxu0 %v328_v32  ;;  %2437 = vmatmul.mubr.bf16.gmra.mrb[56].mxu1 %v327_v28 }
  0xee   : > { %705 = vmatprep.mubr.bf16.mxu0 %v2758_v0  ;;  %2440 = vmatprep.mubr.bf16.mxu1 %v328_v32 }
  0xf5   : > { %706 = vmatmul.mubr.bf16.gmra.mrb[60].mxu0 %v329_v37  ;;  %2441 = vmatmul.mubr.bf16.gmra.mrb[60].mxu1 %v329_v37 }
  0xf6   : > { %715 = vmatprep.mubr.bf16.mxu0 %v2758_v0  ;;  %2444 = vmatprep.mubr.bf16.mxu1 %v330_v38 }
  0xfd   : > { %716 = vmatmul.mubr.bf16.gmra.mrb[64].mxu0 %v330_v38  ;;  %2445 = vmatmul.mubr.bf16.gmra.mrb[64].mxu1 %v331_v44 }
  0xfe   : > { %725 = vmatprep.mubr.bf16.mxu0 %v2758_v0  ;;  %2448 = vmatprep.mubr.bf16.mxu1 %v332_v45 }
 0x105   : > { %726 = vmatmul.mubr.bf16.gmra.mrb[68].mxu0 %v331_v44  ;;  %2449 = vmatmul.mubr.bf16.gmra.mrb[68].mxu1 %v333_v51 }
 0x106   : > { %735 = vmatprep.mubr.bf16.mxu0 %v2758_v0  ;;  %2452 = vmatprep.mubr.bf16.mxu1 %v334_v52 }
 0x10d   : > { %736 = vmatmul.mubr.bf16.gmra.mrb[72].mxu0 %v332_v45  ;;  %2453 = vmatmul.mubr.bf16.gmra.mrb[72].mxu1 %v335_v58 }
 0x10e   : > { %745 = vmatprep.mubr.bf16.mxu0 %v2758_v0  ;;  %2456 = vmatprep.mubr.bf16.mxu1 %v336_v59 }
 0x115   : > { %746 = vmatmul.mubr.bf16.gmra.mrb[76].mxu0 %v333_v51  ;;  %2457 = vmatmul.mubr.bf16.gmra.mrb[76].mxu1 %v337_v63 }
 0x116   : > { %755 = vmatprep.mubr.bf16.mxu0 %v2758_v0  ;;  %2460 = vmatprep.mubr.bf16.mxu1 %v2956_v23  ;;  %v380_v23 = vlaneseq }
 0x11d   : > { %756 = vmatmul.mubr.bf16.gmra.mrb[80].mxu0 %v334_v52  ;;  %2461 = vmatmul.mubr.bf16.gmra.mrb[80].mxu1 %v2968_v31  ;;  %v3088_v31 = vshrl.u32 %v380_v23, 7 }
 0x11e   : > { %765 = vmatprep.mubr.bf16.mxu0 %v2758_v0  ;;  %2464 = vmatprep.mubr.bf16.mxu1 %v2980_v39 }
 0x11f   : > { %v382_v39 = vsub.s32 0, %v3088_v31 }
 0x125   : > { %766 = vmatmul.mubr.bf16.gmra.mrb[84].mxu0 %v335_v58  ;;  %2465 = vmatmul.mubr.bf16.gmra.mrb[84].mxu1 %v2990_v47  ;;  %v3094_v47 = vld [vmem:[%s3488_s2] sm:$0x7] }
 0x126   : > { %775 = vmatprep.mubr.bf16.mxu0 %v2758_v0  ;;  %2468 = vmatprep.mubr.bf16.mxu1 %v2999_v54  ;;  %v386_v54 = vsub.s32 1, %v3088_v31 }
 0x12d   : > { %776 = vmatmul.mubr.bf16.gmra.mrb[88].mxu0 %v336_v59  ;;  %2469 = vmatmul.mubr.bf16.gmra.mrb[88].mxu1 %v3008_v60  ;;  %v3098_v60 = vrot.slane %v3094_v47, %v382_v39 }
 0x12e   : > { %785 = vmatprep.mubr.bf16.mxu0 %v2758_v0  ;;  %2472 = vmatprep.mubr.bf16.mxu1 %v3017_v3  ;;  %v3101_v0 = vrot.slane %v3094_v47, %v386_v54 }
 0x135   : > { %786 = vmatmul.mubr.bf16.gmra.mrb[92].mxu0 %v337_v63  ;;  %2473 = vmatmul.mubr.bf16.gmra.mrb[92].mxu1 %v3026_v9 }
 0x150   : > { %v557_v1 = vpop.f32.mrb[0].mxu0  ;;  %v797_v2 = vpop.f32.mrb[0].mxu1 }
 0x151   : > { %v558_v3 = vadd.f32 %v557_v1, %v3098_v60  ;;  %v798_v4 = vadd.f32 %v797_v2, %v3098_v60  ;;  %v559_v5 = vpop.f32.mrb[1].mxu0  ;;  %v799_v6 = vpop.f32.mrb[1].mxu1 }
 0x152   : > { %v560_v7 = vadd.f32 %v559_v5, %v3101_v0  ;;  %v800_v8 = vadd.f32 %v799_v6, %v3101_v0  ;;  %v561_v9 = vpop.f32.mrb[2].mxu0  ;;  %v801_v10 = vpop.f32.mrb[2].mxu1 }
 0x153   : > { %v562_v11 = vadd.f32 %v561_v9, %v3098_v60  ;;  %v802_v12 = vadd.f32 %v801_v10, %v3098_v60  ;;  %v563_v13 = vpop.f32.mrb[3].mxu0  ;;  %v803_v14 = vpop.f32.mrb[3].mxu1 }
 0x154   : > { %v2228_v15 = vpack.c.bf16 %v560_v7, %v558_v3  ;;  %v2324_v16 = vpack.c.bf16 %v800_v8, %v798_v4  ;;  %v564_v17 = vadd.f32 %v563_v13, %v3101_v0  ;;  %v804_v18 = vadd.f32 %v803_v14, %v3101_v0 }
 0x156   : > { %1805 = vst [vmem:[%s3112_s9] sm:$0xff] %v2228_v15  ;;  %1901 = vst [vmem:[%s3112_s9 + $0x240] sm:$0xff] %v2324_v16  ;;  %v2230_v19 = vpack.c.bf16 %v564_v17, %v562_v11  ;;  %v2326_v20 = vpack.c.bf16 %v804_v18, %v802_v12 }
 0x158   : > { %1807 = vst [vmem:[%s3112_s9 + $0xc] sm:$0xff] %v2230_v19  ;;  %1903 = vst [vmem:[%s3112_s9 + $0x24c] sm:$0xff] %v2326_v20  ;;  %v567_v21 = vpop.f32.mrb[4].mxu0  ;;  %v807_v22 = vpop.f32.mrb[4].mxu1 }
 0x159   : > { %v568_v24 = vadd.f32 %v567_v21, %v3098_v60  ;;  %v808_v25 = vadd.f32 %v807_v22, %v3098_v60  ;;  %v569_v26 = vpop.f32.mrb[5].mxu0  ;;  %v809_v27 = vpop.f32.mrb[5].mxu1 }
 0x15a   : > { %v570_v28 = vadd.f32 %v569_v26, %v3101_v0  ;;  %v810_v29 = vadd.f32 %v809_v27, %v3101_v0  ;;  %v571_v30 = vpop.f32.mrb[6].mxu0  ;;  %v811_v32 = vpop.f32.mrb[6].mxu1 }
 0x15b   : > { %v572_v33 = vadd.f32 %v571_v30, %v3098_v60  ;;  %v812_v34 = vadd.f32 %v811_v32, %v3098_v60  ;;  %v573_v35 = vpop.f32.mrb[7].mxu0  ;;  %v813_v36 = vpop.f32.mrb[7].mxu1 }
 0x15c   : > { %v2232_v37 = vpack.c.bf16 %v570_v28, %v568_v24  ;;  %v2328_v38 = vpack.c.bf16 %v810_v29, %v808_v25  ;;  %v574_v40 = vadd.f32 %v573_v35, %v3101_v0  ;;  %v814_v41 = vadd.f32 %v813_v36, %v3101_v0 }
 0x15e   : > { %1809 = vst [vmem:[%s3112_s9 + $0x18] sm:$0xff] %v2232_v37  ;;  %1905 = vst [vmem:[%s3112_s9 + $0x258] sm:$0xff] %v2328_v38  ;;  %v2234_v42 = vpack.c.bf16 %v574_v40, %v572_v33  ;;  %v2330_v43 = vpack.c.bf16 %v814_v41, %v812_v34 }
 0x160   : > { %1811 = vst [vmem:[%s3112_s9 + $0x24] sm:$0xff] %v2234_v42  ;;  %1907 = vst [vmem:[%s3112_s9 + $0x264] sm:$0xff] %v2330_v43  ;;  %v577_v44 = vpop.f32.mrb[8].mxu0  ;;  %v817_v45 = vpop.f32.mrb[8].mxu1 }
 0x161   : > { %v578_v46 = vadd.f32 %v577_v44, %v3098_v60  ;;  %v818_v48 = vadd.f32 %v817_v45, %v3098_v60  ;;  %v579_v49 = vpop.f32.mrb[9].mxu0  ;;  %v819_v50 = vpop.f32.mrb[9].mxu1 }
 0x162   : > { %v580_v51 = vadd.f32 %v579_v49, %v3101_v0  ;;  %v820_v52 = vadd.f32 %v819_v50, %v3101_v0  ;;  %v581_v53 = vpop.f32.mrb[10].mxu0  ;;  %v821_v55 = vpop.f32.mrb[10].mxu1 }
 0x163   : > { %v582_v56 = vadd.f32 %v581_v53, %v3098_v60  ;;  %v822_v57 = vadd.f32 %v821_v55, %v3098_v60  ;;  %v583_v58 = vpop.f32.mrb[11].mxu0  ;;  %v823_v59 = vpop.f32.mrb[11].mxu1 }
 0x164   : > { %v2236_v61 = vpack.c.bf16 %v580_v51, %v578_v46  ;;  %v2332_v62 = vpack.c.bf16 %v820_v52, %v818_v48  ;;  %v584_v63 = vadd.f32 %v583_v58, %v3101_v0  ;;  %v824_v23 = vadd.f32 %v823_v59, %v3101_v0 }
 0x166   : > { %1813 = vst [vmem:[%s3112_s9 + $0x30] sm:$0xff] %v2236_v61  ;;  %1909 = vst [vmem:[%s3112_s9 + $0x270] sm:$0xff] %v2332_v62  ;;  %v2238_v39 = vpack.c.bf16 %v584_v63, %v582_v56  ;;  %v2334_v54 = vpack.c.bf16 %v824_v23, %v822_v57 }
 0x168   : > { %1815 = vst [vmem:[%s3112_s9 + $0x3c] sm:$0xff] %v2238_v39  ;;  %1911 = vst [vmem:[%s3112_s9 + $0x27c] sm:$0xff] %v2334_v54  ;;  %v587_v1 = vpop.f32.mrb[12].mxu0  ;;  %v827_v2 = vpop.f32.mrb[12].mxu1 }
 0x169   : > { %v588_v3 = vadd.f32 %v587_v1, %v3098_v60  ;;  %v828_v4 = vadd.f32 %v827_v2, %v3098_v60  ;;  %v589_v5 = vpop.f32.mrb[13].mxu0  ;;  %v829_v6 = vpop.f32.mrb[13].mxu1 }
 0x16a   : > { %v590_v7 = vadd.f32 %v589_v5, %v3101_v0  ;;  %v830_v8 = vadd.f32 %v829_v6, %v3101_v0  ;;  %v591_v9 = vpop.f32.mrb[14].mxu0  ;;  %v831_v10 = vpop.f32.mrb[14].mxu1 }
 0x16b   : > { %v592_v11 = vadd.f32 %v591_v9, %v3098_v60  ;;  %v832_v12 = vadd.f32 %v831_v10, %v3098_v60  ;;  %v593_v13 = vpop.f32.mrb[15].mxu0  ;;  %v833_v14 = vpop.f32.mrb[15].mxu1 }
 0x16c   : > { %v2240_v15 = vpack.c.bf16 %v590_v7, %v588_v3  ;;  %v2336_v16 = vpack.c.bf16 %v830_v8, %v828_v4  ;;  %v594_v17 = vadd.f32 %v593_v13, %v3101_v0  ;;  %v834_v18 = vadd.f32 %v833_v14, %v3101_v0 }
 0x16e   : > { %1817 = vst [vmem:[%s3112_s9 + $0x48] sm:$0xff] %v2240_v15  ;;  %1913 = vst [vmem:[%s3112_s9 + $0x288] sm:$0xff] %v2336_v16  ;;  %v2242_v19 = vpack.c.bf16 %v594_v17, %v592_v11  ;;  %v2338_v20 = vpack.c.bf16 %v834_v18, %v832_v12 }
 0x170   : > { %1819 = vst [vmem:[%s3112_s9 + $0x54] sm:$0xff] %v2242_v19  ;;  %1915 = vst [vmem:[%s3112_s9 + $0x294] sm:$0xff] %v2338_v20  ;;  %v597_v21 = vpop.f32.mrb[16].mxu0  ;;  %v837_v22 = vpop.f32.mrb[16].mxu1 }
 0x171   : > { %v598_v24 = vadd.f32 %v597_v21, %v3098_v60  ;;  %v838_v25 = vadd.f32 %v837_v22, %v3098_v60  ;;  %v599_v26 = vpop.f32.mrb[17].mxu0  ;;  %v839_v27 = vpop.f32.mrb[17].mxu1 }
 0x172   : > { %v600_v28 = vadd.f32 %v599_v26, %v3101_v0  ;;  %v840_v29 = vadd.f32 %v839_v27, %v3101_v0  ;;  %v601_v30 = vpop.f32.mrb[18].mxu0  ;;  %v841_v32 = vpop.f32.mrb[18].mxu1 }
 0x173   : > { %v602_v33 = vadd.f32 %v601_v30, %v3098_v60  ;;  %v842_v34 = vadd.f32 %v841_v32, %v3098_v60  ;;  %v603_v35 = vpop.f32.mrb[19].mxu0  ;;  %v843_v36 = vpop.f32.mrb[19].mxu1 }
 0x174   : > { %v2244_v37 = vpack.c.bf16 %v600_v28, %v598_v24  ;;  %v2340_v38 = vpack.c.bf16 %v840_v29, %v838_v25  ;;  %v604_v40 = vadd.f32 %v603_v35, %v3101_v0  ;;  %v844_v41 = vadd.f32 %v843_v36, %v3101_v0 }
 0x175   : > { %v390_v28 = vsub.s32 2, %v3088_v31 }
 0x176   : > { %1821 = vst [vmem:[%s3112_s9 + $0x60] sm:$0xff] %v2244_v37  ;;  %1917 = vst [vmem:[%s3112_s9 + $0x2a0] sm:$0xff] %v2340_v38  ;;  %v2246_v42 = vpack.c.bf16 %v604_v40, %v602_v33  ;;  %v2342_v43 = vpack.c.bf16 %v844_v41, %v842_v34 }
 0x178   : > { %1823 = vst [vmem:[%s3112_s9 + $0x6c] sm:$0xff] %v2246_v42  ;;  %1919 = vst [vmem:[%s3112_s9 + $0x2ac] sm:$0xff] %v2342_v43  ;;  %v607_v44 = vpop.f32.mrb[20].mxu0  ;;  %v847_v45 = vpop.f32.mrb[20].mxu1  ;;  %v3200_v42 = vrot.slane %v3094_v47, %v390_v28 }
 0x179   : > { %v608_v46 = vadd.f32 %v607_v44, %v3098_v60  ;;  %v848_v48 = vadd.f32 %v847_v45, %v3098_v60  ;;  %v609_v49 = vpop.f32.mrb[21].mxu0  ;;  %v849_v50 = vpop.f32.mrb[21].mxu1 }
 0x17a   : > { %v610_v51 = vadd.f32 %v609_v49, %v3101_v0  ;;  %v850_v52 = vadd.f32 %v849_v50, %v3101_v0  ;;  %v611_v53 = vpop.f32.mrb[22].mxu0  ;;  %v851_v55 = vpop.f32.mrb[22].mxu1 }
 0x17b   : > { %v612_v56 = vadd.f32 %v611_v53, %v3098_v60  ;;  %v852_v57 = vadd.f32 %v851_v55, %v3098_v60  ;;  %v613_v58 = vpop.f32.mrb[23].mxu0  ;;  %v853_v59 = vpop.f32.mrb[23].mxu1 }
 0x17c   : > { %v2248_v61 = vpack.c.bf16 %v610_v51, %v608_v46  ;;  %v2344_v62 = vpack.c.bf16 %v850_v52, %v848_v48  ;;  %v614_v63 = vadd.f32 %v613_v58, %v3101_v0  ;;  %v854_v23 = vadd.f32 %v853_v59, %v3101_v0 }
 0x17e   : > { %1825 = vst [vmem:[%s3112_s9 + $0x78] sm:$0xff] %v2248_v61  ;;  %1921 = vst [vmem:[%s3112_s9 + $0x2b8] sm:$0xff] %v2344_v62  ;;  %v2250_v39 = vpack.c.bf16 %v614_v63, %v612_v56  ;;  %v2346_v54 = vpack.c.bf16 %v854_v23, %v852_v57 }
 0x180   : > { %1827 = vst [vmem:[%s3112_s9 + $0x84] sm:$0xff] %v2250_v39  ;;  %1923 = vst [vmem:[%s3112_s9 + $0x2c4] sm:$0xff] %v2346_v54  ;;  %v617_v1 = vpop.f32.mrb[24].mxu0  ;;  %v857_v2 = vpop.f32.mrb[24].mxu1 }
 0x181   : > { %v618_v3 = vadd.f32 %v617_v1, %v3098_v60  ;;  %v858_v4 = vadd.f32 %v857_v2, %v3098_v60  ;;  %v619_v5 = vpop.f32.mrb[25].mxu0  ;;  %v859_v6 = vpop.f32.mrb[25].mxu1 }
 0x182   : > { %v620_v7 = vadd.f32 %v619_v5, %v3101_v0  ;;  %v860_v8 = vadd.f32 %v859_v6, %v3101_v0  ;;  %v621_v9 = vpop.f32.mrb[26].mxu0  ;;  %v861_v10 = vpop.f32.mrb[26].mxu1 }
 0x183   : > { %v622_v11 = vadd.f32 %v621_v9, %v3098_v60  ;;  %v862_v12 = vadd.f32 %v861_v10, %v3098_v60  ;;  %v623_v13 = vpop.f32.mrb[27].mxu0  ;;  %v863_v14 = vpop.f32.mrb[27].mxu1 }
 0x184   : > { %v2252_v15 = vpack.c.bf16 %v620_v7, %v618_v3  ;;  %v2348_v16 = vpack.c.bf16 %v860_v8, %v858_v4  ;;  %v624_v17 = vadd.f32 %v623_v13, %v3101_v0  ;;  %v864_v18 = vadd.f32 %v863_v14, %v3101_v0 }
 0x186   : > { %1829 = vst [vmem:[%s3112_s9 + $0x90] sm:$0xff] %v2252_v15  ;;  %1925 = vst [vmem:[%s3112_s9 + $0x2d0] sm:$0xff] %v2348_v16  ;;  %v2254_v19 = vpack.c.bf16 %v624_v17, %v622_v11  ;;  %v2350_v20 = vpack.c.bf16 %v864_v18, %v862_v12 }
 0x188   : > { %1831 = vst [vmem:[%s3112_s9 + $0x9c] sm:$0xff] %v2254_v19  ;;  %1927 = vst [vmem:[%s3112_s9 + $0x2dc] sm:$0xff] %v2350_v20  ;;  %v627_v21 = vpop.f32.mrb[28].mxu0  ;;  %v867_v22 = vpop.f32.mrb[28].mxu1 }
 0x189   : > { %v628_v24 = vadd.f32 %v627_v21, %v3098_v60  ;;  %v868_v25 = vadd.f32 %v867_v22, %v3098_v60  ;;  %v629_v26 = vpop.f32.mrb[29].mxu0  ;;  %v869_v27 = vpop.f32.mrb[29].mxu1 }
 0x18a   : > { %v630_v29 = vadd.f32 %v629_v26, %v3101_v0  ;;  %v870_v30 = vadd.f32 %v869_v27, %v3101_v0  ;;  %v631_v32 = vpop.f32.mrb[30].mxu0  ;;  %v871_v33 = vpop.f32.mrb[30].mxu1 }
 0x18b   : > { %v632_v34 = vadd.f32 %v631_v32, %v3098_v60  ;;  %v872_v35 = vadd.f32 %v871_v33, %v3098_v60  ;;  %v633_v36 = vpop.f32.mrb[31].mxu0  ;;  %v873_v37 = vpop.f32.mrb[31].mxu1 }
 0x18c   : > { %v2256_v38 = vpack.c.bf16 %v630_v29, %v628_v24  ;;  %v2352_v40 = vpack.c.bf16 %v870_v30, %v868_v25  ;;  %v634_v41 = vadd.f32 %v633_v36, %v3101_v0  ;;  %v874_v31 = vadd.f32 %v873_v37, %v3101_v0 }
 0x18e   : > { %1833 = vst [vmem:[%s3112_s9 + $0xa8] sm:$0xff] %v2256_v38  ;;  %1929 = vst [vmem:[%s3112_s9 + $0x2e8] sm:$0xff] %v2352_v40  ;;  %v2258_v43 = vpack.c.bf16 %v634_v41, %v632_v34  ;;  %v2354_v44 = vpack.c.bf16 %v874_v31, %v872_v35 }
 0x190   : > { %1835 = vst [vmem:[%s3112_s9 + $0xb4] sm:$0xff] %v2258_v43  ;;  %1931 = vst [vmem:[%s3112_s9 + $0x2f4] sm:$0xff] %v2354_v44  ;;  %v637_v45 = vpop.f32.mrb[32].mxu0  ;;  %v2414_v46 = vpop.f32.mrb[32].mxu1 }
 0x191   : > { %v638_v48 = vadd.f32 %v637_v45, %v3098_v60  ;;  %v919_v49 = vadd.f32 %v2414_v46, %v3200_v42  ;;  %v639_v50 = vpop.f32.mrb[33].mxu0  ;;  %v910_v51 = vpop.f32.mrb[33].mxu1 }
 0x192   : > { %v640_v52 = vadd.f32 %v639_v50, %v3101_v0  ;;  %v911_v47 = vadd.f32 %v910_v51, %v3200_v42  ;;  %v641_v53 = vpop.f32.mrb[34].mxu0  ;;  %v2415_v55 = vpop.f32.mrb[34].mxu1 }
 0x193   : > { %v2233_v56 = vpack.c.bf16 %v919_v49, %v919_v49  ;;  %v642_v57 = vadd.f32 %v641_v53, %v3098_v60  ;;  %v922_v58 = vadd.f32 %v2415_v55, %v3200_v42  ;;  %v643_v59 = vpop.f32.mrb[35].mxu0  ;;  %v913_v61 = vpop.f32.mrb[35].mxu1 }
 0x194   : > { %v2260_v62 = vpack.c.bf16 %v640_v52, %v638_v48  ;;  %v2229_v63 = vpack.c.bf16 %v911_v47, %v911_v47  ;;  %v644_v23 = vadd.f32 %v643_v59, %v3101_v0  ;;  %v914_v39 = vadd.f32 %v913_v61, %v3200_v42 }
 0x195   : > { %1810 = vst [vmem:[%s3112_s9 + $0x20] sm:$0xf] %v2233_v56  ;;  %v2235_v54 = vpack.c.bf16 %v922_v58, %v922_v58 }
 0x196   : > { %1837 = vst [vmem:[%s3112_s9 + $0xc0] sm:$0xff] %v2260_v62  ;;  %1806 = vst [vmem:[%s3112_s9 + $0x8] sm:$0xf] %v2229_v63  ;;  %v2262_v1 = vpack.c.bf16 %v644_v23, %v642_v57  ;;  %v2231_v2 = vpack.c.bf16 %v914_v39, %v914_v39 }
 0x197   : > { %1812 = vst [vmem:[%s3112_s9 + $0x2c] sm:$0xf] %v2235_v54 }
 0x198   : > { %1839 = vst [vmem:[%s3112_s9 + $0xcc] sm:$0xff] %v2262_v1  ;;  %1808 = vst [vmem:[%s3112_s9 + $0x14] sm:$0xf] %v2231_v2  ;;  %v647_v3 = vpop.f32.mrb[36].mxu0  ;;  %v2418_v4 = vpop.f32.mrb[36].mxu1 }
 0x199   : > { %v648_v5 = vadd.f32 %v647_v3, %v3098_v60  ;;  %v935_v6 = vadd.f32 %v2418_v4, %v3200_v42  ;;  %v649_v7 = vpop.f32.mrb[37].mxu0  ;;  %v926_v8 = vpop.f32.mrb[37].mxu1 }
 0x19a   : > { %v650_v9 = vadd.f32 %v649_v7, %v3101_v0  ;;  %v927_v10 = vadd.f32 %v926_v8, %v3200_v42  ;;  %v651_v11 = vpop.f32.mrb[38].mxu0  ;;  %v2419_v12 = vpop.f32.mrb[38].mxu1 }
 0x19b   : > { %v2241_v13 = vpack.c.bf16 %v935_v6, %v935_v6  ;;  %v652_v14 = vadd.f32 %v651_v11, %v3098_v60  ;;  %v938_v15 = vadd.f32 %v2419_v12, %v3200_v42  ;;  %v653_v16 = vpop.f32.mrb[39].mxu0  ;;  %v929_v17 = vpop.f32.mrb[39].mxu1 }
 0x19c   : > { %v2264_v18 = vpack.c.bf16 %v650_v9, %v648_v5  ;;  %v2237_v19 = vpack.c.bf16 %v927_v10, %v927_v10  ;;  %v654_v20 = vadd.f32 %v653_v16, %v3101_v0  ;;  %v930_v21 = vadd.f32 %v929_v17, %v3200_v42 }
 0x19d   : > { %1818 = vst [vmem:[%s3112_s9 + $0x50] sm:$0xf] %v2241_v13  ;;  %v2243_v22 = vpack.c.bf16 %v938_v15, %v938_v15 }
 0x19e   : > { %1841 = vst [vmem:[%s3112_s9 + $0xd8] sm:$0xff] %v2264_v18  ;;  %1814 = vst [vmem:[%s3112_s9 + $0x38] sm:$0xf] %v2237_v19  ;;  %v2266_v24 = vpack.c.bf16 %v654_v20, %v652_v14  ;;  %v2239_v25 = vpack.c.bf16 %v930_v21, %v930_v21 }
 0x19f   : > { %1820 = vst [vmem:[%s3112_s9 + $0x5c] sm:$0xf] %v2243_v22 }
 0x1a0   : > { %1843 = vst [vmem:[%s3112_s9 + $0xe4] sm:$0xff] %v2266_v24  ;;  %1816 = vst [vmem:[%s3112_s9 + $0x44] sm:$0xf] %v2239_v25  ;;  %v657_v26 = vpop.f32.mrb[40].mxu0  ;;  %v2422_v27 = vpop.f32.mrb[40].mxu1 }
 0x1a1   : > { %v658_v28 = vadd.f32 %v657_v26, %v3098_v60  ;;  %v951_v29 = vadd.f32 %v2422_v27, %v3200_v42  ;;  %v659_v30 = vpop.f32.mrb[41].mxu0  ;;  %v942_v32 = vpop.f32.mrb[41].mxu1 }
 0x1a2   : > { %v660_v33 = vadd.f32 %v659_v30, %v3101_v0  ;;  %v943_v34 = vadd.f32 %v942_v32, %v3200_v42  ;;  %v661_v35 = vpop.f32.mrb[42].mxu0  ;;  %v2423_v36 = vpop.f32.mrb[42].mxu1 }
 0x1a3   : > { %v2249_v37 = vpack.c.bf16 %v951_v29, %v951_v29  ;;  %v662_v38 = vadd.f32 %v661_v35, %v3098_v60  ;;  %v954_v40 = vadd.f32 %v2423_v36, %v3200_v42  ;;  %v663_v41 = vpop.f32.mrb[43].mxu0  ;;  %v945_v31 = vpop.f32.mrb[43].mxu1 }
 0x1a4   : > { %v2268_v43 = vpack.c.bf16 %v660_v33, %v658_v28  ;;  %v2245_v44 = vpack.c.bf16 %v943_v34, %v943_v34  ;;  %v664_v45 = vadd.f32 %v663_v41, %v3101_v0  ;;  %v946_v46 = vadd.f32 %v945_v31, %v3200_v42 }
 0x1a5   : > { %1826 = vst [vmem:[%s3112_s9 + $0x80] sm:$0xf] %v2249_v37  ;;  %v2251_v48 = vpack.c.bf16 %v954_v40, %v954_v40 }
 0x1a6   : > { %1845 = vst [vmem:[%s3112_s9 + $0xf0] sm:$0xff] %v2268_v43  ;;  %1822 = vst [vmem:[%s3112_s9 + $0x68] sm:$0xf] %v2245_v44  ;;  %v2270_v49 = vpack.c.bf16 %v664_v45, %v662_v38  ;;  %v2247_v50 = vpack.c.bf16 %v946_v46, %v946_v46 }
 0x1a7   : > { %1828 = vst [vmem:[%s3112_s9 + $0x8c] sm:$0xf] %v2251_v48 }
 0x1a8   : > { %1847 = vst [vmem:[%s3112_s9 + $0xfc] sm:$0xff] %v2270_v49  ;;  %1824 = vst [vmem:[%s3112_s9 + $0x74] sm:$0xf] %v2247_v50  ;;  %v667_v51 = vpop.f32.mrb[44].mxu0  ;;  %v2426_v52 = vpop.f32.mrb[44].mxu1 }
 0x1a9   : > { %v668_v47 = vadd.f32 %v667_v51, %v3098_v60  ;;  %v967_v53 = vadd.f32 %v2426_v52, %v3200_v42  ;;  %v669_v55 = vpop.f32.mrb[45].mxu0  ;;  %v958_v56 = vpop.f32.mrb[45].mxu1 }
 0x1aa   : > { %v670_v57 = vadd.f32 %v669_v55, %v3101_v0  ;;  %v959_v58 = vadd.f32 %v958_v56, %v3200_v42  ;;  %v671_v59 = vpop.f32.mrb[46].mxu0  ;;  %v2427_v61 = vpop.f32.mrb[46].mxu1 }
 0x1ab   : > { %v2257_v62 = vpack.c.bf16 %v967_v53, %v967_v53  ;;  %v672_v63 = vadd.f32 %v671_v59, %v3098_v60  ;;  %v970_v23 = vadd.f32 %v2427_v61, %v3200_v42  ;;  %v673_v39 = vpop.f32.mrb[47].mxu0  ;;  %v961_v54 = vpop.f32.mrb[47].mxu1 }
 0x1ac   : > { %v2272_v1 = vpack.c.bf16 %v670_v57, %v668_v47  ;;  %v2253_v2 = vpack.c.bf16 %v959_v58, %v959_v58  ;;  %v674_v3 = vadd.f32 %v673_v39, %v3101_v0  ;;  %v962_v4 = vadd.f32 %v961_v54, %v3200_v42 }
 0x1ad   : > { %1834 = vst [vmem:[%s3112_s9 + $0xb0] sm:$0xf] %v2257_v62  ;;  %v2259_v5 = vpack.c.bf16 %v970_v23, %v970_v23 }
 0x1ae   : > { %1849 = vst [vmem:[%s3112_s9 + $0x108] sm:$0xff] %v2272_v1  ;;  %1830 = vst [vmem:[%s3112_s9 + $0x98] sm:$0xf] %v2253_v2  ;;  %v2274_v6 = vpack.c.bf16 %v674_v3, %v672_v63  ;;  %v2255_v7 = vpack.c.bf16 %v962_v4, %v962_v4 }
 0x1af   : > { %1836 = vst [vmem:[%s3112_s9 + $0xbc] sm:$0xf] %v2259_v5 }
 0x1b0   : > { %1851 = vst [vmem:[%s3112_s9 + $0x114] sm:$0xff] %v2274_v6  ;;  %1832 = vst [vmem:[%s3112_s9 + $0xa4] sm:$0xf] %v2255_v7  ;;  %v677_v8 = vpop.f32.mrb[48].mxu0  ;;  %v2430_v9 = vpop.f32.mrb[48].mxu1 }
 0x1b1   : > { %v678_v10 = vadd.f32 %v677_v8, %v3098_v60  ;;  %v983_v11 = vadd.f32 %v2430_v9, %v3200_v42  ;;  %v679_v12 = vpop.f32.mrb[49].mxu0  ;;  %v974_v13 = vpop.f32.mrb[49].mxu1 }
 0x1b2   : > { %v680_v14 = vadd.f32 %v679_v12, %v3101_v0  ;;  %v975_v15 = vadd.f32 %v974_v13, %v3200_v42  ;;  %v681_v16 = vpop.f32.mrb[50].mxu0  ;;  %v2431_v17 = vpop.f32.mrb[50].mxu1 }
 0x1b3   : > { %v2265_v18 = vpack.c.bf16 %v983_v11, %v983_v11  ;;  %v682_v19 = vadd.f32 %v681_v16, %v3098_v60  ;;  %v986_v20 = vadd.f32 %v2431_v17, %v3200_v42  ;;  %v683_v21 = vpop.f32.mrb[51].mxu0  ;;  %v977_v22 = vpop.f32.mrb[51].mxu1 }
 0x1b4   : > { %v2276_v24 = vpack.c.bf16 %v680_v14, %v678_v10  ;;  %v2261_v25 = vpack.c.bf16 %v975_v15, %v975_v15  ;;  %v684_v26 = vadd.f32 %v683_v21, %v3101_v0  ;;  %v978_v27 = vadd.f32 %v977_v22, %v3200_v42 }
 0x1b5   : > { %1842 = vst [vmem:[%s3112_s9 + $0xe0] sm:$0xf] %v2265_v18  ;;  %v2267_v28 = vpack.c.bf16 %v986_v20, %v986_v20 }
 0x1b6   : > { %1853 = vst [vmem:[%s3112_s9 + $0x120] sm:$0xff] %v2276_v24  ;;  %1838 = vst [vmem:[%s3112_s9 + $0xc8] sm:$0xf] %v2261_v25  ;;  %v2278_v29 = vpack.c.bf16 %v684_v26, %v682_v19  ;;  %v2263_v30 = vpack.c.bf16 %v978_v27, %v978_v27 }
 0x1b7   : > { %1844 = vst [vmem:[%s3112_s9 + $0xec] sm:$0xf] %v2267_v28 }
 0x1b8   : > { %1855 = vst [vmem:[%s3112_s9 + $0x12c] sm:$0xff] %v2278_v29  ;;  %1840 = vst [vmem:[%s3112_s9 + $0xd4] sm:$0xf] %v2263_v30  ;;  %v687_v32 = vpop.f32.mrb[52].mxu0  ;;  %v2434_v33 = vpop.f32.mrb[52].mxu1 }
 0x1b9   : > { %v688_v34 = vadd.f32 %v687_v32, %v3098_v60  ;;  %v999_v35 = vadd.f32 %v2434_v33, %v3200_v42  ;;  %v689_v36 = vpop.f32.mrb[53].mxu0  ;;  %v990_v37 = vpop.f32.mrb[53].mxu1 }
 0x1ba   : > { %v690_v38 = vadd.f32 %v689_v36, %v3101_v0  ;;  %v991_v40 = vadd.f32 %v990_v37, %v3200_v42  ;;  %v691_v41 = vpop.f32.mrb[54].mxu0  ;;  %v2435_v31 = vpop.f32.mrb[54].mxu1 }
 0x1bb   : > { %v2273_v43 = vpack.c.bf16 %v999_v35, %v999_v35  ;;  %v692_v44 = vadd.f32 %v691_v41, %v3098_v60  ;;  %v1002_v45 = vadd.f32 %v2435_v31, %v3200_v42  ;;  %v693_v46 = vpop.f32.mrb[55].mxu0  ;;  %v993_v48 = vpop.f32.mrb[55].mxu1 }
 0x1bc   : > { %v2280_v49 = vpack.c.bf16 %v690_v38, %v688_v34  ;;  %v2269_v50 = vpack.c.bf16 %v991_v40, %v991_v40  ;;  %v694_v51 = vadd.f32 %v693_v46, %v3101_v0  ;;  %v994_v52 = vadd.f32 %v993_v48, %v3200_v42 }
 0x1bd   : > { %1850 = vst [vmem:[%s3112_s9 + $0x110] sm:$0xf] %v2273_v43  ;;  %v2275_v47 = vpack.c.bf16 %v1002_v45, %v1002_v45 }
 0x1be   : > { %1857 = vst [vmem:[%s3112_s9 + $0x138] sm:$0xff] %v2280_v49  ;;  %1846 = vst [vmem:[%s3112_s9 + $0xf8] sm:$0xf] %v2269_v50  ;;  %v2282_v53 = vpack.c.bf16 %v694_v51, %v692_v44  ;;  %v2271_v55 = vpack.c.bf16 %v994_v52, %v994_v52 }
 0x1bf   : > { %1852 = vst [vmem:[%s3112_s9 + $0x11c] sm:$0xf] %v2275_v47 }
 0x1c0   : > { %1859 = vst [vmem:[%s3112_s9 + $0x144] sm:$0xff] %v2282_v53  ;;  %1848 = vst [vmem:[%s3112_s9 + $0x104] sm:$0xf] %v2271_v55  ;;  %v697_v56 = vpop.f32.mrb[56].mxu0  ;;  %v2438_v57 = vpop.f32.mrb[56].mxu1 }
 0x1c1   : > { %v698_v58 = vadd.f32 %v697_v56, %v3098_v60  ;;  %v1015_v59 = vadd.f32 %v2438_v57, %v3200_v42  ;;  %v699_v61 = vpop.f32.mrb[57].mxu0  ;;  %v1006_v62 = vpop.f32.mrb[57].mxu1 }
 0x1c2   : > { %v700_v63 = vadd.f32 %v699_v61, %v3101_v0  ;;  %v1007_v23 = vadd.f32 %v1006_v62, %v3200_v42  ;;  %v701_v39 = vpop.f32.mrb[58].mxu0  ;;  %v2439_v54 = vpop.f32.mrb[58].mxu1 }
 0x1c3   : > { %v2281_v1 = vpack.c.bf16 %v1015_v59, %v1015_v59  ;;  %v702_v2 = vadd.f32 %v701_v39, %v3098_v60  ;;  %v1018_v3 = vadd.f32 %v2439_v54, %v3200_v42  ;;  %v703_v4 = vpop.f32.mrb[59].mxu0  ;;  %v1009_v5 = vpop.f32.mrb[59].mxu1 }
 0x1c4   : > { %v2284_v6 = vpack.c.bf16 %v700_v63, %v698_v58  ;;  %v2277_v7 = vpack.c.bf16 %v1007_v23, %v1007_v23  ;;  %v704_v8 = vadd.f32 %v703_v4, %v3101_v0  ;;  %v1010_v9 = vadd.f32 %v1009_v5, %v3200_v42 }
 0x1c5   : > { %1858 = vst [vmem:[%s3112_s9 + $0x140] sm:$0xf] %v2281_v1  ;;  %v2283_v10 = vpack.c.bf16 %v1018_v3, %v1018_v3 }
 0x1c6   : > { %1861 = vst [vmem:[%s3112_s9 + $0x150] sm:$0xff] %v2284_v6  ;;  %1854 = vst [vmem:[%s3112_s9 + $0x128] sm:$0xf] %v2277_v7  ;;  %v2286_v11 = vpack.c.bf16 %v704_v8, %v702_v2  ;;  %v2279_v12 = vpack.c.bf16 %v1010_v9, %v1010_v9 }
 0x1c7   : > { %1860 = vst [vmem:[%s3112_s9 + $0x14c] sm:$0xf] %v2283_v10 }
 0x1c8   : > { %1863 = vst [vmem:[%s3112_s9 + $0x15c] sm:$0xff] %v2286_v11  ;;  %1856 = vst [vmem:[%s3112_s9 + $0x134] sm:$0xf] %v2279_v12  ;;  %v707_v13 = vpop.f32.mrb[60].mxu0  ;;  %v2442_v14 = vpop.f32.mrb[60].mxu1 }
 0x1c9   : > { %v708_v15 = vadd.f32 %v707_v13, %v3098_v60  ;;  %v1031_v16 = vadd.f32 %v2442_v14, %v3200_v42  ;;  %v709_v17 = vpop.f32.mrb[61].mxu0  ;;  %v1022_v18 = vpop.f32.mrb[61].mxu1 }
 0x1ca   : > { %v710_v19 = vadd.f32 %v709_v17, %v3101_v0  ;;  %v1023_v20 = vadd.f32 %v1022_v18, %v3200_v42  ;;  %v711_v21 = vpop.f32.mrb[62].mxu0  ;;  %v2443_v22 = vpop.f32.mrb[62].mxu1 }
 0x1cb   : > { %v2289_v24 = vpack.c.bf16 %v1031_v16, %v1031_v16  ;;  %v712_v25 = vadd.f32 %v711_v21, %v3098_v60  ;;  %v1034_v26 = vadd.f32 %v2443_v22, %v3200_v42  ;;  %v713_v27 = vpop.f32.mrb[63].mxu0  ;;  %v1025_v28 = vpop.f32.mrb[63].mxu1 }
 0x1cc   : > { %v2288_v29 = vpack.c.bf16 %v710_v19, %v708_v15  ;;  %v2285_v30 = vpack.c.bf16 %v1023_v20, %v1023_v20  ;;  %v714_v32 = vadd.f32 %v713_v27, %v3101_v0  ;;  %v1026_v33 = vadd.f32 %v1025_v28, %v3200_v42 }
 0x1cd   : > { %1866 = vst [vmem:[%s3112_s9 + $0x170] sm:$0xf] %v2289_v24  ;;  %v2291_v34 = vpack.c.bf16 %v1034_v26, %v1034_v26 }
 0x1ce   : > { %1865 = vst [vmem:[%s3112_s9 + $0x168] sm:$0xff] %v2288_v29  ;;  %1862 = vst [vmem:[%s3112_s9 + $0x158] sm:$0xf] %v2285_v30  ;;  %v2290_v35 = vpack.c.bf16 %v714_v32, %v712_v25  ;;  %v2287_v36 = vpack.c.bf16 %v1026_v33, %v1026_v33 }
 0x1cf   : > { %1868 = vst [vmem:[%s3112_s9 + $0x17c] sm:$0xf] %v2291_v34 }
 0x1d0   : > { %1867 = vst [vmem:[%s3112_s9 + $0x174] sm:$0xff] %v2290_v35  ;;  %1864 = vst [vmem:[%s3112_s9 + $0x164] sm:$0xf] %v2287_v36  ;;  %v717_v37 = vpop.f32.mrb[64].mxu0  ;;  %v2446_v38 = vpop.f32.mrb[64].mxu1 }
 0x1d1   : > { %v718_v40 = vadd.f32 %v717_v37, %v3098_v60  ;;  %v1047_v41 = vadd.f32 %v2446_v38, %v3200_v42  ;;  %v719_v31 = vpop.f32.mrb[65].mxu0  ;;  %v1038_v43 = vpop.f32.mrb[65].mxu1 }
 0x1d2   : > { %v720_v44 = vadd.f32 %v719_v31, %v3101_v0  ;;  %v1039_v45 = vadd.f32 %v1038_v43, %v3200_v42  ;;  %v721_v46 = vpop.f32.mrb[66].mxu0  ;;  %v2447_v48 = vpop.f32.mrb[66].mxu1 }
 0x1d3   : > { %v2297_v49 = vpack.c.bf16 %v1047_v41, %v1047_v41  ;;  %v722_v50 = vadd.f32 %v721_v46, %v3098_v60  ;;  %v1050_v51 = vadd.f32 %v2447_v48, %v3200_v42  ;;  %v723_v52 = vpop.f32.mrb[67].mxu0  ;;  %v1041_v47 = vpop.f32.mrb[67].mxu1 }
 0x1d4   : > { %v2292_v53 = vpack.c.bf16 %v720_v44, %v718_v40  ;;  %v2293_v55 = vpack.c.bf16 %v1039_v45, %v1039_v45  ;;  %v724_v56 = vadd.f32 %v723_v52, %v3101_v0  ;;  %v1042_v57 = vadd.f32 %v1041_v47, %v3200_v42 }
 0x1d5   : > { %1874 = vst [vmem:[%s3112_s9 + $0x1a0] sm:$0xf] %v2297_v49  ;;  %v2299_v58 = vpack.c.bf16 %v1050_v51, %v1050_v51 }
 0x1d6   : > { %1869 = vst [vmem:[%s3112_s9 + $0x180] sm:$0xff] %v2292_v53  ;;  %1870 = vst [vmem:[%s3112_s9 + $0x188] sm:$0xf] %v2293_v55  ;;  %v2294_v59 = vpack.c.bf16 %v724_v56, %v722_v50  ;;  %v2295_v61 = vpack.c.bf16 %v1042_v57, %v1042_v57 }
 0x1d7   : > { %1876 = vst [vmem:[%s3112_s9 + $0x1ac] sm:$0xf] %v2299_v58 }
 0x1d8   : > { %1871 = vst [vmem:[%s3112_s9 + $0x18c] sm:$0xff] %v2294_v59  ;;  %1872 = vst [vmem:[%s3112_s9 + $0x194] sm:$0xf] %v2295_v61  ;;  %v727_v62 = vpop.f32.mrb[68].mxu0  ;;  %v2450_v63 = vpop.f32.mrb[68].mxu1 }
 0x1d9   : > { %v728_v23 = vadd.f32 %v727_v62, %v3098_v60  ;;  %v1063_v39 = vadd.f32 %v2450_v63, %v3200_v42  ;;  %v729_v54 = vpop.f32.mrb[69].mxu0  ;;  %v1054_v1 = vpop.f32.mrb[69].mxu1 }
 0x1da   : > { %v730_v2 = vadd.f32 %v729_v54, %v3101_v0  ;;  %v1055_v3 = vadd.f32 %v1054_v1, %v3200_v42  ;;  %v731_v4 = vpop.f32.mrb[70].mxu0  ;;  %v2451_v5 = vpop.f32.mrb[70].mxu1 }
 0x1db   : > { %v2305_v6 = vpack.c.bf16 %v1063_v39, %v1063_v39  ;;  %v732_v7 = vadd.f32 %v731_v4, %v3098_v60  ;;  %v1066_v8 = vadd.f32 %v2451_v5, %v3200_v42  ;;  %v733_v9 = vpop.f32.mrb[71].mxu0  ;;  %v1057_v10 = vpop.f32.mrb[71].mxu1 }
 0x1dc   : > { %v2296_v11 = vpack.c.bf16 %v730_v2, %v728_v23  ;;  %v2301_v12 = vpack.c.bf16 %v1055_v3, %v1055_v3  ;;  %v734_v13 = vadd.f32 %v733_v9, %v3101_v0  ;;  %v1058_v14 = vadd.f32 %v1057_v10, %v3200_v42 }
 0x1dd   : > { %1882 = vst [vmem:[%s3112_s9 + $0x1d0] sm:$0xf] %v2305_v6  ;;  %v2307_v15 = vpack.c.bf16 %v1066_v8, %v1066_v8 }
 0x1de   : > { %1873 = vst [vmem:[%s3112_s9 + $0x198] sm:$0xff] %v2296_v11  ;;  %1878 = vst [vmem:[%s3112_s9 + $0x1b8] sm:$0xf] %v2301_v12  ;;  %v2298_v16 = vpack.c.bf16 %v734_v13, %v732_v7  ;;  %v2303_v17 = vpack.c.bf16 %v1058_v14, %v1058_v14 }
 0x1df   : > { %1884 = vst [vmem:[%s3112_s9 + $0x1dc] sm:$0xf] %v2307_v15 }
 0x1e0   : > { %1875 = vst [vmem:[%s3112_s9 + $0x1a4] sm:$0xff] %v2298_v16  ;;  %1880 = vst [vmem:[%s3112_s9 + $0x1c4] sm:$0xf] %v2303_v17  ;;  %v737_v18 = vpop.f32.mrb[72].mxu0  ;;  %v2454_v19 = vpop.f32.mrb[72].mxu1 }
 0x1e1   : > { %v738_v20 = vadd.f32 %v737_v18, %v3098_v60  ;;  %v1079_v21 = vadd.f32 %v2454_v19, %v3200_v42  ;;  %v739_v22 = vpop.f32.mrb[73].mxu0  ;;  %v1070_v24 = vpop.f32.mrb[73].mxu1 }
 0x1e2   : > { %v740_v25 = vadd.f32 %v739_v22, %v3101_v0  ;;  %v1071_v26 = vadd.f32 %v1070_v24, %v3200_v42  ;;  %v741_v27 = vpop.f32.mrb[74].mxu0  ;;  %v2455_v28 = vpop.f32.mrb[74].mxu1 }
 0x1e3   : > { %v2313_v29 = vpack.c.bf16 %v1079_v21, %v1079_v21  ;;  %v742_v30 = vadd.f32 %v741_v27, %v3098_v60  ;;  %v1082_v32 = vadd.f32 %v2455_v28, %v3200_v42  ;;  %v743_v33 = vpop.f32.mrb[75].mxu0  ;;  %v1073_v34 = vpop.f32.mrb[75].mxu1 }
 0x1e4   : > { %v2300_v35 = vpack.c.bf16 %v740_v25, %v738_v20  ;;  %v2309_v36 = vpack.c.bf16 %v1071_v26, %v1071_v26  ;;  %v744_v37 = vadd.f32 %v743_v33, %v3101_v0  ;;  %v1074_v38 = vadd.f32 %v1073_v34, %v3200_v42 }
 0x1e5   : > { %1890 = vst [vmem:[%s3112_s9 + $0x200] sm:$0xf] %v2313_v29  ;;  %v2315_v40 = vpack.c.bf16 %v1082_v32, %v1082_v32 }
 0x1e6   : > { %1877 = vst [vmem:[%s3112_s9 + $0x1b0] sm:$0xff] %v2300_v35  ;;  %1886 = vst [vmem:[%s3112_s9 + $0x1e8] sm:$0xf] %v2309_v36  ;;  %v2302_v41 = vpack.c.bf16 %v744_v37, %v742_v30  ;;  %v2311_v31 = vpack.c.bf16 %v1074_v38, %v1074_v38 }
 0x1e7   : > { %1892 = vst [vmem:[%s3112_s9 + $0x20c] sm:$0xf] %v2315_v40 }
 0x1e8   : > { %1879 = vst [vmem:[%s3112_s9 + $0x1bc] sm:$0xff] %v2302_v41  ;;  %1888 = vst [vmem:[%s3112_s9 + $0x1f4] sm:$0xf] %v2311_v31  ;;  %v747_v43 = vpop.f32.mrb[76].mxu0  ;;  %v2458_v44 = vpop.f32.mrb[76].mxu1 }
 0x1e9   : > { %v748_v45 = vadd.f32 %v747_v43, %v3098_v60  ;;  %v1095_v46 = vadd.f32 %v2458_v44, %v3200_v42  ;;  %v749_v48 = vpop.f32.mrb[77].mxu0  ;;  %v1086_v49 = vpop.f32.mrb[77].mxu1 }
 0x1ea   : > { %v750_v50 = vadd.f32 %v749_v48, %v3101_v0  ;;  %v1087_v51 = vadd.f32 %v1086_v49, %v3200_v42  ;;  %v751_v52 = vpop.f32.mrb[78].mxu0  ;;  %v2459_v47 = vpop.f32.mrb[78].mxu1 }
 0x1eb   : > { %v2321_v53 = vpack.c.bf16 %v1095_v46, %v1095_v46  ;;  %v752_v55 = vadd.f32 %v751_v52, %v3098_v60  ;;  %v1098_v56 = vadd.f32 %v2459_v47, %v3200_v42  ;;  %v753_v57 = vpop.f32.mrb[79].mxu0  ;;  %v1089_v58 = vpop.f32.mrb[79].mxu1 }
 0x1ec   : > { %v2304_v59 = vpack.c.bf16 %v750_v50, %v748_v45  ;;  %v2317_v61 = vpack.c.bf16 %v1087_v51, %v1087_v51  ;;  %v754_v62 = vadd.f32 %v753_v57, %v3101_v0  ;;  %v1090_v63 = vadd.f32 %v1089_v58, %v3200_v42 }
 0x1ed   : > { %1898 = vst [vmem:[%s3112_s9 + $0x230] sm:$0xf] %v2321_v53  ;;  %v2323_v23 = vpack.c.bf16 %v1098_v56, %v1098_v56 }
 0x1ee   : > { %1881 = vst [vmem:[%s3112_s9 + $0x1c8] sm:$0xff] %v2304_v59  ;;  %1894 = vst [vmem:[%s3112_s9 + $0x218] sm:$0xf] %v2317_v61  ;;  %v2306_v39 = vpack.c.bf16 %v754_v62, %v752_v55  ;;  %v2319_v54 = vpack.c.bf16 %v1090_v63, %v1090_v63 }
 0x1ef   : > { %1900 = vst [vmem:[%s3112_s9 + $0x23c] sm:$0xf] %v2323_v23 }
 0x1f0   : > { %1883 = vst [vmem:[%s3112_s9 + $0x1d4] sm:$0xff] %v2306_v39  ;;  %1896 = vst [vmem:[%s3112_s9 + $0x224] sm:$0xf] %v2319_v54  ;;  %v757_v1 = vpop.f32.mrb[80].mxu0  ;;  %v2462_v2 = vpop.f32.mrb[80].mxu1 }
 0x1f1   : > { %v758_v3 = vadd.f32 %v757_v1, %v3098_v60  ;;  %v1111_v4 = vadd.f32 %v2462_v2, %v3200_v42  ;;  %v759_v5 = vpop.f32.mrb[81].mxu0  ;;  %v1102_v6 = vpop.f32.mrb[81].mxu1 }
 0x1f2   : > { %v760_v7 = vadd.f32 %v759_v5, %v3101_v0  ;;  %v1103_v8 = vadd.f32 %v1102_v6, %v3200_v42  ;;  %v761_v9 = vpop.f32.mrb[82].mxu0  ;;  %v2463_v10 = vpop.f32.mrb[82].mxu1 }
 0x1f3   : > { %v2329_v11 = vpack.c.bf16 %v1111_v4, %v1111_v4  ;;  %v762_v12 = vadd.f32 %v761_v9, %v3098_v60  ;;  %v1114_v13 = vadd.f32 %v2463_v10, %v3200_v42  ;;  %v763_v14 = vpop.f32.mrb[83].mxu0  ;;  %v1105_v15 = vpop.f32.mrb[83].mxu1 }
 0x1f4   : > { %v2308_v16 = vpack.c.bf16 %v760_v7, %v758_v3  ;;  %v2325_v17 = vpack.c.bf16 %v1103_v8, %v1103_v8  ;;  %v764_v18 = vadd.f32 %v763_v14, %v3101_v0  ;;  %v1106_v19 = vadd.f32 %v1105_v15, %v3200_v42 }
 0x1f5   : > { %1906 = vst [vmem:[%s3112_s9 + $0x260] sm:$0xf] %v2329_v11  ;;  %v2331_v20 = vpack.c.bf16 %v1114_v13, %v1114_v13 }
 0x1f6   : > { %1885 = vst [vmem:[%s3112_s9 + $0x1e0] sm:$0xff] %v2308_v16  ;;  %1902 = vst [vmem:[%s3112_s9 + $0x248] sm:$0xf] %v2325_v17  ;;  %v2310_v21 = vpack.c.bf16 %v764_v18, %v762_v12  ;;  %v2327_v22 = vpack.c.bf16 %v1106_v19, %v1106_v19 }
 0x1f7   : > { %1908 = vst [vmem:[%s3112_s9 + $0x26c] sm:$0xf] %v2331_v20 }
 0x1f8   : > { %1887 = vst [vmem:[%s3112_s9 + $0x1ec] sm:$0xff] %v2310_v21  ;;  %1904 = vst [vmem:[%s3112_s9 + $0x254] sm:$0xf] %v2327_v22  ;;  %v767_v24 = vpop.f32.mrb[84].mxu0  ;;  %v2466_v25 = vpop.f32.mrb[84].mxu1 }
 0x1f9   : > { %v768_v26 = vadd.f32 %v767_v24, %v3098_v60  ;;  %v1127_v27 = vadd.f32 %v2466_v25, %v3200_v42  ;;  %v769_v28 = vpop.f32.mrb[85].mxu0  ;;  %v1118_v29 = vpop.f32.mrb[85].mxu1 }
 0x1fa   : > { %v770_v30 = vadd.f32 %v769_v28, %v3101_v0  ;;  %v1119_v32 = vadd.f32 %v1118_v29, %v3200_v42  ;;  %v771_v33 = vpop.f32.mrb[86].mxu0  ;;  %v2467_v34 = vpop.f32.mrb[86].mxu1 }
 0x1fb   : > { %v2337_v35 = vpack.c.bf16 %v1127_v27, %v1127_v27  ;;  %v772_v36 = vadd.f32 %v771_v33, %v3098_v60  ;;  %v1130_v37 = vadd.f32 %v2467_v34, %v3200_v42  ;;  %v773_v38 = vpop.f32.mrb[87].mxu0  ;;  %v1121_v40 = vpop.f32.mrb[87].mxu1 }
 0x1fc   : > { %v2312_v41 = vpack.c.bf16 %v770_v30, %v768_v26  ;;  %v2333_v31 = vpack.c.bf16 %v1119_v32, %v1119_v32  ;;  %v774_v43 = vadd.f32 %v773_v38, %v3101_v0  ;;  %v1122_v44 = vadd.f32 %v1121_v40, %v3200_v42 }
 0x1fd   : > { %1914 = vst [vmem:[%s3112_s9 + $0x290] sm:$0xf] %v2337_v35  ;;  %v2339_v45 = vpack.c.bf16 %v1130_v37, %v1130_v37 }
 0x1fe   : > { %1889 = vst [vmem:[%s3112_s9 + $0x1f8] sm:$0xff] %v2312_v41  ;;  %1910 = vst [vmem:[%s3112_s9 + $0x278] sm:$0xf] %v2333_v31  ;;  %v2314_v46 = vpack.c.bf16 %v774_v43, %v772_v36  ;;  %v2335_v48 = vpack.c.bf16 %v1122_v44, %v1122_v44 }
 0x1ff   : > { %1916 = vst [vmem:[%s3112_s9 + $0x29c] sm:$0xf] %v2339_v45 }
 0x200   : > { %1891 = vst [vmem:[%s3112_s9 + $0x204] sm:$0xff] %v2314_v46  ;;  %1912 = vst [vmem:[%s3112_s9 + $0x284] sm:$0xf] %v2335_v48  ;;  %v777_v49 = vpop.f32.mrb[88].mxu0  ;;  %v2470_v50 = vpop.f32.mrb[88].mxu1 }
 0x201   : > { %v778_v51 = vadd.f32 %v777_v49, %v3098_v60  ;;  %v1143_v52 = vadd.f32 %v2470_v50, %v3200_v42  ;;  %v779_v47 = vpop.f32.mrb[89].mxu0  ;;  %v1134_v53 = vpop.f32.mrb[89].mxu1 }
 0x202   : > { %v780_v55 = vadd.f32 %v779_v47, %v3101_v0  ;;  %v1135_v56 = vadd.f32 %v1134_v53, %v3200_v42  ;;  %v781_v57 = vpop.f32.mrb[90].mxu0  ;;  %v2471_v58 = vpop.f32.mrb[90].mxu1 }
 0x203   : > { %v2345_v59 = vpack.c.bf16 %v1143_v52, %v1143_v52  ;;  %v782_v61 = vadd.f32 %v781_v57, %v3098_v60  ;;  %v1146_v62 = vadd.f32 %v2471_v58, %v3200_v42  ;;  %v783_v63 = vpop.f32.mrb[91].mxu0  ;;  %v1137_v23 = vpop.f32.mrb[91].mxu1 }
 0x204   : > { %v2316_v39 = vpack.c.bf16 %v780_v55, %v778_v51  ;;  %v2341_v54 = vpack.c.bf16 %v1135_v56, %v1135_v56  ;;  %v784_v1 = vadd.f32 %v783_v63, %v3101_v0  ;;  %v1138_v2 = vadd.f32 %v1137_v23, %v3200_v42 }
 0x205   : > { %1922 = vst [vmem:[%s3112_s9 + $0x2c0] sm:$0xf] %v2345_v59  ;;  %v2347_v3 = vpack.c.bf16 %v1146_v62, %v1146_v62 }
 0x206   : > { %1893 = vst [vmem:[%s3112_s9 + $0x210] sm:$0xff] %v2316_v39  ;;  %1918 = vst [vmem:[%s3112_s9 + $0x2a8] sm:$0xf] %v2341_v54  ;;  %v2318_v4 = vpack.c.bf16 %v784_v1, %v782_v61  ;;  %v2343_v5 = vpack.c.bf16 %v1138_v2, %v1138_v2 }
 0x207   : > { %1924 = vst [vmem:[%s3112_s9 + $0x2cc] sm:$0xf] %v2347_v3 }
 0x208   : > { %1895 = vst [vmem:[%s3112_s9 + $0x21c] sm:$0xff] %v2318_v4  ;;  %1920 = vst [vmem:[%s3112_s9 + $0x2b4] sm:$0xf] %v2343_v5  ;;  %v787_v6 = vpop.f32.mrb[92].mxu0  ;;  %v2474_v7 = vpop.f32.mrb[92].mxu1 }
 0x209   : > { %v788_v8 = vadd.f32 %v787_v6, %v3098_v60  ;;  %v1159_v9 = vadd.f32 %v2474_v7, %v3200_v42  ;;  %v789_v10 = vpop.f32.mrb[93].mxu0  ;;  %v1150_v11 = vpop.f32.mrb[93].mxu1 }
 0x20a   : > { %v790_v12 = vadd.f32 %v789_v10, %v3101_v0  ;;  %v1151_v13 = vadd.f32 %v1150_v11, %v3200_v42  ;;  %v791_v14 = vpop.f32.mrb[94].mxu0  ;;  %v2475_v15 = vpop.f32.mrb[94].mxu1 }
 0x20b   : > { %v2353_v16 = vpack.c.bf16 %v1159_v9, %v1159_v9  ;;  %v792_v17 = vadd.f32 %v791_v14, %v3098_v60  ;;  %v1162_v18 = vadd.f32 %v2475_v15, %v3200_v42  ;;  %v793_v19 = vpop.f32.mrb[95].mxu0  ;;  %v1153_v20 = vpop.f32.mrb[95].mxu1 }
 0x20c   : > { %v2320_v21 = vpack.c.bf16 %v790_v12, %v788_v8  ;;  %v2349_v22 = vpack.c.bf16 %v1151_v13, %v1151_v13  ;;  %v794_v24 = vadd.f32 %v793_v19, %v3101_v0  ;;  %v1154_v25 = vadd.f32 %v1153_v20, %v3200_v42 }
 0x20d   : > { %1930 = vst [vmem:[%s3112_s9 + $0x2f0] sm:$0xf] %v2353_v16  ;;  %v2355_v26 = vpack.c.bf16 %v1162_v18, %v1162_v18 }
 0x20e   : > { %1897 = vst [vmem:[%s3112_s9 + $0x228] sm:$0xff] %v2320_v21  ;;  %1926 = vst [vmem:[%s3112_s9 + $0x2d8] sm:$0xf] %v2349_v22  ;;  %v2322_v60 = vpack.c.bf16 %v794_v24, %v792_v17  ;;  %v2351_v27 = vpack.c.bf16 %v1154_v25, %v1154_v25 }
 0x20f   : > { %1932 = vst [vmem:[%s3112_s9 + $0x2fc] sm:$0xf] %v2355_v26 }
 0x210   : > { %1899 = vst [vmem:[%s3112_s9 + $0x234] sm:$0xff] %v2322_v60  ;;  %1928 = vst [vmem:[%s3112_s9 + $0x2e4] sm:$0xf] %v2351_v27 }
 0x211   : > { %2677 = shalt.err (!%p2674_p5)
}
 0x212   : > { %s2678_s29 = scalar_lea.hbm %s3430_s26, 12288  ;;  %s2682_s20 = scalar_lea.hbm %s3489_s3, 24576 }
 0x213   : > { %p2679_p9 = scmp.ne.s32.totalorder %s3430_s26, %s2678_s29  ;;  %p2683_p3 = scmp.lt.u32.totalorder %s3430_s26, %s3489_s3 }
 0x214   : > { %p2684_p7 = scmp.lt.u32.totalorder %s2682_s20, %s2678_s29  ;;  %p2686_p4 = scmp.lt.u32.totalorder %s2678_s29, %s3430_s26 }
 0x215   : > { %p2680_p1 = pnand %p2679_p9, %p2878_p10 }
 0x216   : > { %p2685_p13 = por %p2684_p7, %p2683_p3 }
 0x217   : > { %p2681_p2 = pneg %p2680_p1 }
 0x218   : > { %p2687_p6 = por %p2686_p4, %p2685_p13 }
 0x21a   : > { %p2688_p8 = pnand %p2687_p6, %p2681_p2 }
 0x21c   : > { %2691 = shalt.err (!%p2688_p8)
}
 0x21d   : > { %s2760_s9 = smov 192   ;;  %s2761_s10 = smov 12  }
 0x21e   : > { %2500 = dma.vmem_to_hbm [thread:$0]  (%p2878_p10), %s3432_s11, 12288, %s3430_s26, %s1934_s7, %s2760_s9, %s2760_s9, %s2761_s10  }
 0x21f PF: > { %s1965_s15 = sand.u32 1, %s2730_s12   ;;  %p3507_p12 = scmp.ne.s32.totalorder %s3497_s23, 0 }
 0x220   : > { %p3508_p11 = scmp.ge.s32.totalorder %s2750_s17, 2  ;;  %s1966_s18 = scalar_lea.sflag [#allocation4], %s1965_s15 }
 0x222   : > { %p2511_p0 = pnand %p3508_p11, %p3507_p12 }
 0x224   : > { %2725 = dma.done.wait (!%p2511_p0), %s1966_s18, 12288  }
 0x225   : > { %2727 = vsyncadd (!%p2511_p0), %s1966_s18, 4294955008  ;;  %s20_s17 = sadd.s32 1, %s2750_s17   ;;  %s3509_s12 = smov %s2734_s13 }
 0x226   : > { %p17_p5 = scmp.ge.s32.totalorder %s20_s17, 4   ;;  %s3510_s13 = smov %s2738_s14 }
 0x227   : > { %s3511_s14 = smov %s2887_s5  ;;  %s3512_s15 = smov %s2746_s16 }
 0x228   : > { %s3513_s16 = smov %s3515_s28  ;;  %19 = sbr.rel (!%p17_p5) target bundleno = 7 (0x7), region = 85 }
 0x22f   :  { %1971 = vsyncpa [#allocation3], 1 }
 0x230   :  { %1973 = vsyncpa [#allocation3 + $0x1], 1 }
 0x231   :  { %1974 = vsyncpa [#allocation6], 1 }
 0x232   :  { %1975 = vsyncpa [#allocation4], 1 }
 0x233   :  { %1977 = vsyncpa [#allocation4 + $0x1], 1 }

</bundles_post_ra>
